<compile_context>
chip_gen: v7x
topology: tpu7x:2x2x1
jax: 0.10.0
libtpu: 0.0.40
codegen_flags: <defaults>
</compile_context>

<pallas_src>
import numpy as np
import jax
import jax.numpy as jnp
from jax.experimental import pallas as pl
from jax.experimental.pallas import tpu as pltpu

EPS = 1e-5        # InstanceNorm2d / LayerNorm eps
SLOPE = 0.2       # LeakyReLU(0.2)
TB_CAP = 1024     # max batch rows per grid step (fits v7x's 64 MiB VMEM in f32)
OUT_LANES = 128   # lane-dense packed output width


# ------------------------------ fused kernel --------------------------------

def _fused_kernel(x_ref, m1_ref, m2_ref, s1m_ref, s1b_ref, s2m_ref, s2b_ref,
                  s2w_ref, head_ref, packf_ref, packp_ref, bias_ref, out_ref):
    f32 = jnp.float32

    def inorm_lrelu(y, sm, sb):
        # InstanceNorm2d (no affine) over each channel's spatial positions:
        # per-(row, channel) stats via two independent matmuls against the
        # host-precomputed mean-segment matrix (1/seglen folded in), then a
        # fused y*scale + shift normalization, then LeakyReLU(0.2).
        mu = jnp.dot(y, sm, preferred_element_type=f32)            # (TB, nseg)
        ey2 = jnp.dot(y * y, sm, preferred_element_type=f32)       # (TB, nseg)
        scale = jax.lax.rsqrt(jnp.maximum(ey2 - mu * mu, 0.0) + EPS)
        yn = (y * jnp.dot(scale, sb, preferred_element_type=f32)
              + jnp.dot(-mu * scale, sb, preferred_element_type=f32))
        return jnp.where(yn > 0, yn, SLOPE * yn)

    x = x_ref[...]                                                 # (TB, 256) f32

    # main[0]: Conv2d(1->ndf, 4, 2, 1, bias=False) + InstanceNorm2d + LeakyReLU
    y1 = jnp.dot(x.astype(jnp.bfloat16), m1_ref[...],
                 preferred_element_type=f32)                       # (TB, ndf*64)
    a1 = inorm_lrelu(y1, s1m_ref[...], s1b_ref[...])

    # main[1]: Conv2d(ndf->2ndf, 4, 2, 1, bias=False) + InstanceNorm2d + LeakyReLU
    y2 = jnp.dot(a1.astype(jnp.bfloat16), m2_ref[...],
                 preferred_element_type=f32)                       # (TB, c2*16)
    a2 = inorm_lrelu(y2, s2m_ref[...], s2b_ref[...])

    # feat_extract_layer: depthwise 4x4 'valid' conv + Flatten, folded into a
    # per-channel weighted-sum matrix (w_dw baked into s2w host-side).
    feat = jnp.dot(a2, s2w_ref[...], preferred_element_type=f32)   # (TB, c2)

    # output_layer: LayerNorm(c2) + LeakyReLU(0.2) + Linear(c2, 1)
    mu = jnp.mean(feat, axis=1, keepdims=True)
    ex2 = jnp.mean(feat * feat, axis=1, keepdims=True)
    fn = (feat - mu) * jax.lax.rsqrt(jnp.maximum(ex2 - mu * mu, 0.0) + EPS)
    fn = fn * head_ref[0:1, :] + head_ref[1:2, :]                  # ln_w, ln_b
    fa = jnp.where(fn > 0, fn, SLOPE * fn)

    # Lane-dense packed output: feat -> lanes [0, c2), pred -> lane c2.
    # packp holds lin_w in column c2 (so this dot IS the Linear layer) and
    # bias holds lin_b at lane c2.  Single unmasked (TB, 128) store.
    out_ref[...] = (jnp.dot(feat, packf_ref[...], preferred_element_type=f32)
                    + jnp.dot(fa, packp_ref[...], preferred_element_type=f32)
                    + bias_ref[...])


# ------------------------- parameter preprocessing ---------------------------

def _conv_to_matrix(w, in_hw, stride, pad):
    """Fold Conv2d(cin->cout, k, stride, pad, bias=False) into M such that
    flat_out = flat_in @ M with NCHW row-major flattening."""
    w = np.asarray(w, np.float32)
    cout, cin, kh, kw = w.shape
    out_hw = (in_hw + 2 * pad - kh) // stride + 1
    m = np.zeros((cin * in_hw * in_hw, cout * out_hw * out_hw), np.float32)
    for oc in range(cout):
        for ci in range(cin):
            for oh in range(out_hw):
                for ow in range(out_hw):
                    col = oc * out_hw * out_hw + oh * out_hw + ow
                    for ki in range(kh):
                        ih = oh * stride - pad + ki
                        if not (0 <= ih < in_hw):
                            continue
                        for kj in range(kw):
                            iw = ow * stride - pad + kj
                            if 0 <= iw < in_hw:
                                row = ci * in_hw * in_hw + ih * in_hw + iw
                                m[row, col] += w[oc, ci, ki, kj]
    return m, out_hw


def _segment_matrix(nseg, seglen, col_vals):
    """(nseg*seglen, nseg) block matrix; column c holds col_vals[c] over its
    channel's seglen rows (col_vals may be scalar or shape (nseg, seglen))."""
    m = np.zeros((nseg * seglen, nseg), np.float32)
    vals = np.broadcast_to(np.asarray(col_vals, np.float32), (nseg, seglen))
    for c in range(nseg):
        m[c * seglen:(c + 1) * seglen, c] = vals[c]
    return m


def prepare_params(params, isize=16):
    """One-time host-side weight folding / packing (outside the hot path)."""
    ndf = params['w1'].shape[0]
    c2 = params['w2'].shape[0]
    m1, hw1 = _conv_to_matrix(params['w1'], isize, 2, 1)   # 16x16 -> 8x8
    m2, hw2 = _conv_to_matrix(params['w2'], hw1, 2, 1)     # 8x8  -> 4x4
    n_sp1, n_sp2 = hw1 * hw1, hw2 * hw2
    assert hw2 == 4, "kernel specialized to the isize=16 two-level pyramid"

    # InstanceNorm segment matrices (mean factor folded) + broadcast matrices.
    s1m = _segment_matrix(ndf, n_sp1, 1.0 / n_sp1)
    s1b = _segment_matrix(ndf, n_sp1, 1.0).T
    s2m = _segment_matrix(c2, n_sp2, 1.0 / n_sp2)
    s2b = _segment_matrix(c2, n_sp2, 1.0).T
    # Depthwise feat_extract conv folded into a per-channel weighted sum.
    wdw = np.asarray(params['w_dw'], np.float32).reshape(c2, n_sp2)
    s2w = _segment_matrix(c2, n_sp2, wdw)

    # Output-layer constants and lane-dense output packing matrices.
    out_w = ((c2 + 1 + OUT_LANES - 1) // OUT_LANES) * OUT_LANES
    head = np.stack([np.asarray(params['ln_w'], np.float32),
                     np.asarray(params['ln_b'], np.float32)], axis=0)
    packf = np.zeros((c2, out_w), np.float32)
    packf[np.arange(c2), np.arange(c2)] = 1.0                        # feat -> lanes [0, c2)
    packp = np.zeros((c2, out_w), np.float32)
    packp[:, c2] = np.asarray(params['lin_w'], np.float32).reshape(c2)  # Linear -> lane c2
    bias = np.zeros((1, out_w), np.float32)
    bias[0, c2] = float(np.asarray(params['lin_b'], np.float32)[0])

    return dict(
        m1=jnp.asarray(m1, jnp.bfloat16),   # bf16 MXU operands, f32 accumulation
        m2=jnp.asarray(m2, jnp.bfloat16),
        s1m=jnp.asarray(s1m), s1b=jnp.asarray(s1b),
        s2m=jnp.asarray(s2m), s2b=jnp.asarray(s2b),
        s2w=jnp.asarray(s2w),
        head=jnp.asarray(head),
        packf=jnp.asarray(packf), packp=jnp.asarray(packp),
        bias=jnp.asarray(bias),
    )


# --------------------------------- forward ----------------------------------

def discriminator_forward(x, prep):
    """Whole Discriminator forward as a single fused pallas_call.
    Returns (pred (B, 1), feat (B, c2)) matching the PyTorch module."""
    B = x.shape[0]
    in_feat = prep['m1'].shape[0]
    c2 = prep['head'].shape[1]
    out_w = prep['packf'].shape[1]
    x2 = x.reshape(B, in_feat)          # metadata-only flatten; no pad, no copy pass

    # Batch tiling: one grid step for small batches (dense MXU M-dim / vreg
    # sublanes, no per-step pipeline overhead); tile at TB_CAP rows only for
    # large batches and only then shard the grid across cores ("parallel").
    if B <= TB_CAP:
        nt, tb = 1, B
    else:
        tb = TB_CAP
        nt = pl.cdiv(B, tb)             # ragged last tile handled by Pallas masking

    # Grid-invariant constant blocks (weights / segment / packing matrices).
    # NOTE: they keep Pallas's default buffering; pl.Buffered(1) would shave
    # ~1 MiB of double-buffer VMEM but is omitted for compile portability.
    def const(a):
        return pl.BlockSpec(a.shape, lambda t: (0, 0))

    weights = (prep['m1'], prep['m2'], prep['s1m'], prep['s1b'], prep['s2m'],
               prep['s2b'], prep['s2w'], prep['head'], prep['packf'],
               prep['packp'], prep['bias'])

    out = pl.pallas_call(
        _fused_kernel,
        out_shape=jax.ShapeDtypeStruct((B, out_w), jnp.float32),
        grid=(nt,),
        in_specs=[pl.BlockSpec((tb, in_feat), lambda t: (t, 0))]
                 + [const(w) for w in weights],
        out_specs=pl.BlockSpec((tb, out_w), lambda t: (t, 0)),
        compiler_params=pltpu.CompilerParams(
            dimension_semantics=("parallel",) if nt > 1 else ("arbitrary",),
            vmem_limit_bytes=48 * 1024 * 1024),
    )(x2, *weights)

    pred = out[:, c2:c2 + 1]
    feat = out[:, :c2]
    return pred, feat


# ------------------------------ init / reference -----------------------------

def init_params(key, ndf):
    k1, k2, k3, k4, k5 = jax.random.split(key, 5)
    c2 = ndf * 2
    return dict(
        w1=0.1 * jax.random.normal(k1, (ndf, 1, 4, 4), jnp.float32),    # Conv2d(1, ndf, 4,2,1)
        w2=0.1 * jax.random.normal(k2, (c2, ndf, 4, 4), jnp.float32),   # Conv2d(ndf, 2ndf, 4,2,1)
        w_dw=0.1 * jax.random.normal(k3, (c2, 1, 4, 4), jnp.float32),   # depthwise Conv2d
        ln_w=jnp.ones((c2,), jnp.float32),                              # LayerNorm weight
        ln_b=jnp.zeros((c2,), jnp.float32),                             # LayerNorm bias
        lin_w=0.1 * jax.random.normal(k4, (1, c2), jnp.float32),        # Linear(c2, 1)
        lin_b=0.1 * jax.random.normal(k5, (1,), jnp.float32),
    )


def reference_forward(x, params):
    hp = jax.lax.Precision.HIGHEST

    def lrelu(v):
        return jnp.where(v > 0, v, SLOPE * v)

    def inorm(v):
        mu = v.mean(axis=(2, 3), keepdims=True)
        var = ((v - mu) ** 2).mean(axis=(2, 3), keepdims=True)
        return (v - mu) / jnp.sqrt(var + EPS)

    def conv(v, w, stride, pad, groups=1):
        return jax.lax.conv_general_dilated(
            v, w, (stride, stride), [(pad, pad), (pad, pad)],
            dimension_numbers=('NCHW', 'OIHW', 'NCHW'),
            feature_group_count=groups, precision=hp)

    c2 = params['w2'].shape[0]
    y = lrelu(inorm(conv(x, params['w1'], 2, 1)))
    y = lrelu(inorm(conv(y, params['w2'], 2, 1)))
    feat = conv(y, params['w_dw'], 1, 0, groups=c2).reshape(x.shape[0], c2)
    mu = feat.mean(-1, keepdims=True)
    var = ((feat - mu) ** 2).mean(-1, keepdims=True)
    fn = (feat - mu) / jnp.sqrt(var + EPS) * params['ln_w'] + params['ln_b']
    fa = lrelu(fn)
    pred = jnp.dot(fa, params['lin_w'].T, precision=hp) + params['lin_b']
    return pred, feat


# ----------------------------------- main ------------------------------------

if __name__ == "__main__":
    key = jax.random.PRNGKey(0)
    kx, kp = jax.random.split(key)
    isize, ndf, B = 16, 8, 2
    x = jax.random.normal(kx, (B, 1, isize, isize), jnp.float32)
    params = init_params(kp, ndf)

    prep = prepare_params(params, isize=isize)      # one-time weight folding
    fwd = jax.jit(discriminator_forward)
    pred, feat = fwd(x, prep)
    jax.block_until_ready((pred, feat))

    pred_ref, feat_ref = reference_forward(x, params)
    assert pred.shape == (B, 1) and feat.shape == (B, 2 * ndf)
    # Tolerance covers bf16 matmul operands (f32 accumulation) vs the
    # HIGHEST-precision f32 reference convolutions.
    assert jnp.allclose(pred, pred_ref, atol=2e-2, rtol=2e-2)
    assert jnp.allclose(feat, feat_ref, atol=2e-2, rtol=2e-2)
    print("KERNEL_OK")
</pallas_src>

<mosaic_0001>
module attributes {stable_mosaic.version = 11 : i64} {
  func.func @_fused_kernel(%arg0: i32, %arg1: memref<2x256xf32, #tpu.memory_space<vmem>>, %arg2: memref<256x512xbf16, #tpu.memory_space<vmem>>, %arg3: memref<512x256xbf16, #tpu.memory_space<vmem>>, %arg4: memref<512x8xf32, #tpu.memory_space<vmem>>, %arg5: memref<8x512xf32, #tpu.memory_space<vmem>>, %arg6: memref<256x16xf32, #tpu.memory_space<vmem>>, %arg7: memref<16x256xf32, #tpu.memory_space<vmem>>, %arg8: memref<256x16xf32, #tpu.memory_space<vmem>>, %arg9: memref<2x16xf32, #tpu.memory_space<vmem>>, %arg10: memref<16x128xf32, #tpu.memory_space<vmem>>, %arg11: memref<16x128xf32, #tpu.memory_space<vmem>>, %arg12: memref<1x128xf32, #tpu.memory_space<vmem>>, %arg13: memref<2x128xf32, #tpu.memory_space<vmem>>) attributes {dimension_semantics = [#tpu.dimension_semantics<arbitrary>], iteration_bounds = array<i64: 1>, scalar_prefetch = 0 : i64, scratch_operands = 0 : i64, tpu.core_type = #tpu.core_type<tc>, window_params = [{transform_indices = @transform_0, window_bounds = array<i64: 2, 256>}, {pipeline_mode = #tpu.pipeline_mode<synchronous>, transform_indices = @transform_1, window_bounds = array<i64: 256, 512>}, {pipeline_mode = #tpu.pipeline_mode<synchronous>, transform_indices = @transform_2, window_bounds = array<i64: 512, 256>}, {pipeline_mode = #tpu.pipeline_mode<synchronous>, transform_indices = @transform_3, window_bounds = array<i64: 512, 8>}, {pipeline_mode = #tpu.pipeline_mode<synchronous>, transform_indices = @transform_4, window_bounds = array<i64: 8, 512>}, {pipeline_mode = #tpu.pipeline_mode<synchronous>, transform_indices = @transform_5, window_bounds = array<i64: 256, 16>}, {pipeline_mode = #tpu.pipeline_mode<synchronous>, transform_indices = @transform_6, window_bounds = array<i64: 16, 256>}, {pipeline_mode = #tpu.pipeline_mode<synchronous>, transform_indices = @transform_7, window_bounds = array<i64: 256, 16>}, {pipeline_mode = #tpu.pipeline_mode<synchronous>, transform_indices = @transform_8, window_bounds = array<i64: 2, 16>}, {pipeline_mode = #tpu.pipeline_mode<synchronous>, transform_indices = @transform_9, window_bounds = array<i64: 16, 128>}, {pipeline_mode = #tpu.pipeline_mode<synchronous>, transform_indices = @transform_10, window_bounds = array<i64: 16, 128>}, {pipeline_mode = #tpu.pipeline_mode<synchronous>, transform_indices = @transform_11, window_bounds = array<i64: 1, 128>}, {transform_indices = @transform_12, window_bounds = array<i64: 2, 128>}]} {
    %c0 = arith.constant 0 : index
    %c0_0 = arith.constant 0 : index
    %0 = vector.load %arg1[%c0, %c0_0] : memref<2x256xf32, #tpu.memory_space<vmem>>, vector<2x256xf32>
    %1 = arith.truncf %0 : vector<2x256xf32> to vector<2x256xbf16>
    %c0_1 = arith.constant 0 : index
    %c0_2 = arith.constant 0 : index
    %2 = vector.load %arg2[%c0_1, %c0_2] : memref<256x512xbf16, #tpu.memory_space<vmem>>, vector<256x512xbf16>
    %cst = arith.constant dense<0.000000e+00> : vector<2x512xf32>
    %3 = tpu.matmul %1, %2, %cst {dimension_numbers = #tpu.dot_dimension_numbers<[1], [0], [0], [1], [0, 0, 1, 1], [], []>} : vector<2x256xbf16>, vector<256x512xbf16>, vector<2x512xf32> -> vector<2x512xf32>
    %c0_3 = arith.constant 0 : index
    %c0_4 = arith.constant 0 : index
    %4 = vector.load %arg4[%c0_3, %c0_4] : memref<512x8xf32, #tpu.memory_space<vmem>>, vector<512x8xf32>
    %c0_5 = arith.constant 0 : index
    %c0_6 = arith.constant 0 : index
    %5 = vector.load %arg5[%c0_5, %c0_6] : memref<8x512xf32, #tpu.memory_space<vmem>>, vector<8x512xf32>
    %cst_7 = arith.constant dense<0.000000e+00> : vector<2x8xf32>
    %6 = tpu.matmul %3, %4, %cst_7 {dimension_numbers = #tpu.dot_dimension_numbers<[1], [0], [0], [1], [0, 0, 1, 1], [], []>} : vector<2x512xf32>, vector<512x8xf32>, vector<2x8xf32> -> vector<2x8xf32>
    %7 = arith.mulf %3, %3 : vector<2x512xf32>
    %cst_8 = arith.constant dense<0.000000e+00> : vector<2x8xf32>
    %8 = tpu.matmul %7, %4, %cst_8 {dimension_numbers = #tpu.dot_dimension_numbers<[1], [0], [0], [1], [0, 0, 1, 1], [], []>} : vector<2x512xf32>, vector<512x8xf32>, vector<2x8xf32> -> vector<2x8xf32>
    %9 = arith.mulf %6, %6 : vector<2x8xf32>
    %10 = arith.subf %8, %9 : vector<2x8xf32>
    %cst_9 = arith.constant 0.000000e+00 : f32
    %11 = vector.broadcast %cst_9 : f32 to vector<2x8xf32>
    %12 = arith.maximumf %10, %11 : vector<2x8xf32>
    %cst_10 = arith.constant 9.99999974E-6 : f32
    %13 = vector.broadcast %cst_10 : f32 to vector<2x8xf32>
    %14 = arith.addf %12, %13 : vector<2x8xf32>
    %15 = math.rsqrt %14 : vector<2x8xf32>
    %cst_11 = arith.constant dense<0.000000e+00> : vector<2x512xf32>
    %16 = tpu.matmul %15, %5, %cst_11 {dimension_numbers = #tpu.dot_dimension_numbers<[1], [0], [0], [1], [0, 0, 1, 1], [], []>} : vector<2x8xf32>, vector<8x512xf32>, vector<2x512xf32> -> vector<2x512xf32>
    %17 = arith.mulf %3, %16 : vector<2x512xf32>
    %cst_12 = arith.constant 0.000000e+00 : f32
    %18 = vector.broadcast %cst_12 : f32 to vector<2x8xf32>
    %19 = arith.subf %18, %6 : vector<2x8xf32>
    %20 = arith.mulf %19, %15 : vector<2x8xf32>
    %cst_13 = arith.constant dense<0.000000e+00> : vector<2x512xf32>
    %21 = tpu.matmul %20, %5, %cst_13 {dimension_numbers = #tpu.dot_dimension_numbers<[1], [0], [0], [1], [0, 0, 1, 1], [], []>} : vector<2x8xf32>, vector<8x512xf32>, vector<2x512xf32> -> vector<2x512xf32>
    %22 = arith.addf %17, %21 : vector<2x512xf32>
    %cst_14 = arith.constant 0.000000e+00 : f32
    %23 = vector.broadcast %cst_14 : f32 to vector<2x512xf32>
    %24 = arith.cmpf ogt, %22, %23 : vector<2x512xf32>
    %cst_15 = arith.constant 2.000000e-01 : f32
    %25 = vector.broadcast %cst_15 : f32 to vector<2x512xf32>
    %26 = arith.mulf %25, %22 : vector<2x512xf32>
    %27 = arith.select %24, %22, %26 : vector<2x512xi1>, vector<2x512xf32>
    %28 = arith.truncf %27 : vector<2x512xf32> to vector<2x512xbf16>
    %c0_16 = arith.constant 0 : index
    %c0_17 = arith.constant 0 : index
    %29 = vector.load %arg3[%c0_16, %c0_17] : memref<512x256xbf16, #tpu.memory_space<vmem>>, vector<512x256xbf16>
    %cst_18 = arith.constant dense<0.000000e+00> : vector<2x256xf32>
    %30 = tpu.matmul %28, %29, %cst_18 {dimension_numbers = #tpu.dot_dimension_numbers<[1], [0], [0], [1], [0, 0, 1, 1], [], []>} : vector<2x512xbf16>, vector<512x256xbf16>, vector<2x256xf32> -> vector<2x256xf32>
    %c0_19 = arith.constant 0 : index
    %c0_20 = arith.constant 0 : index
    %31 = vector.load %arg6[%c0_19, %c0_20] : memref<256x16xf32, #tpu.memory_space<vmem>>, vector<256x16xf32>
    %c0_21 = arith.constant 0 : index
    %c0_22 = arith.constant 0 : index
    %32 = vector.load %arg7[%c0_21, %c0_22] : memref<16x256xf32, #tpu.memory_space<vmem>>, vector<16x256xf32>
    %cst_23 = arith.constant dense<0.000000e+00> : vector<2x16xf32>
    %33 = tpu.matmul %30, %31, %cst_23 {dimension_numbers = #tpu.dot_dimension_numbers<[1], [0], [0], [1], [0, 0, 1, 1], [], []>} : vector<2x256xf32>, vector<256x16xf32>, vector<2x16xf32> -> vector<2x16xf32>
    %34 = arith.mulf %30, %30 : vector<2x256xf32>
    %cst_24 = arith.constant dense<0.000000e+00> : vector<2x16xf32>
    %35 = tpu.matmul %34, %31, %cst_24 {dimension_numbers = #tpu.dot_dimension_numbers<[1], [0], [0], [1], [0, 0, 1, 1], [], []>} : vector<2x256xf32>, vector<256x16xf32>, vector<2x16xf32> -> vector<2x16xf32>
    %36 = arith.mulf %33, %33 : vector<2x16xf32>
    %37 = arith.subf %35, %36 : vector<2x16xf32>
    %cst_25 = arith.constant 0.000000e+00 : f32
    %38 = vector.broadcast %cst_25 : f32 to vector<2x16xf32>
    %39 = arith.maximumf %37, %38 : vector<2x16xf32>
    %cst_26 = arith.constant 9.99999974E-6 : f32
    %40 = vector.broadcast %cst_26 : f32 to vector<2x16xf32>
    %41 = arith.addf %39, %40 : vector<2x16xf32>
    %42 = math.rsqrt %41 : vector<2x16xf32>
    %cst_27 = arith.constant dense<0.000000e+00> : vector<2x256xf32>
    %43 = tpu.matmul %42, %32, %cst_27 {dimension_numbers = #tpu.dot_dimension_numbers<[1], [0], [0], [1], [0, 0, 1, 1], [], []>} : vector<2x16xf32>, vector<16x256xf32>, vector<2x256xf32> -> vector<2x256xf32>
    %44 = arith.mulf %30, %43 : vector<2x256xf32>
    %cst_28 = arith.constant 0.000000e+00 : f32
    %45 = vector.broadcast %cst_28 : f32 to vector<2x16xf32>
    %46 = arith.subf %45, %33 : vector<2x16xf32>
    %47 = arith.mulf %46, %42 : vector<2x16xf32>
    %cst_29 = arith.constant dense<0.000000e+00> : vector<2x256xf32>
    %48 = tpu.matmul %47, %32, %cst_29 {dimension_numbers = #tpu.dot_dimension_numbers<[1], [0], [0], [1], [0, 0, 1, 1], [], []>} : vector<2x16xf32>, vector<16x256xf32>, vector<2x256xf32> -> vector<2x256xf32>
    %49 = arith.addf %44, %48 : vector<2x256xf32>
    %cst_30 = arith.constant 0.000000e+00 : f32
    %50 = vector.broadcast %cst_30 : f32 to vector<2x256xf32>
    %51 = arith.cmpf ogt, %49, %50 : vector<2x256xf32>
    %cst_31 = arith.constant 2.000000e-01 : f32
    %52 = vector.broadcast %cst_31 : f32 to vector<2x256xf32>
    %53 = arith.mulf %52, %49 : vector<2x256xf32>
    %54 = arith.select %51, %49, %53 : vector<2x256xi1>, vector<2x256xf32>
    %c0_32 = arith.constant 0 : index
    %c0_33 = arith.constant 0 : index
    %55 = vector.load %arg8[%c0_32, %c0_33] : memref<256x16xf32, #tpu.memory_space<vmem>>, vector<256x16xf32>
    %cst_34 = arith.constant dense<0.000000e+00> : vector<2x16xf32>
    %56 = tpu.matmul %54, %55, %cst_34 {dimension_numbers = #tpu.dot_dimension_numbers<[1], [0], [0], [1], [0, 0, 1, 1], [], []>} : vector<2x256xf32>, vector<256x16xf32>, vector<2x16xf32> -> vector<2x16xf32>
    %cst_35 = arith.constant dense<0.000000e+00> : vector<2xf32>
    %57 = vector.multi_reduction <add>, %56, %cst_35 [1] : vector<2x16xf32> to vector<2xf32>
    %58 = vector.shape_cast %57 : vector<2xf32> to vector<2x1xf32>
    %cst_36 = arith.constant 1.600000e+01 : f32
    %59 = vector.broadcast %cst_36 : f32 to vector<2x1xf32>
    %60 = arith.divf %58, %59 : vector<2x1xf32>
    %61 = arith.mulf %56, %56 : vector<2x16xf32>
    %cst_37 = arith.constant dense<0.000000e+00> : vector<2xf32>
    %62 = vector.multi_reduction <add>, %61, %cst_37 [1] : vector<2x16xf32> to vector<2xf32>
    %63 = vector.shape_cast %62 : vector<2xf32> to vector<2x1xf32>
    %cst_38 = arith.constant 1.600000e+01 : f32
    %64 = vector.broadcast %cst_38 : f32 to vector<2x1xf32>
    %65 = arith.divf %63, %64 : vector<2x1xf32>
    %66 = vector.broadcast %60 : vector<2x1xf32> to vector<2x16xf32>
    %67 = arith.subf %56, %66 : vector<2x16xf32>
    %68 = arith.mulf %60, %60 : vector<2x1xf32>
    %69 = arith.subf %65, %68 : vector<2x1xf32>
    %cst_39 = arith.constant 0.000000e+00 : f32
    %70 = vector.broadcast %cst_39 : f32 to vector<2x1xf32>
    %71 = arith.maximumf %69, %70 : vector<2x1xf32>
    %cst_40 = arith.constant 9.99999974E-6 : f32
    %72 = vector.broadcast %cst_40 : f32 to vector<2x1xf32>
    %73 = arith.addf %71, %72 : vector<2x1xf32>
    %74 = math.rsqrt %73 : vector<2x1xf32>
    %75 = vector.broadcast %74 : vector<2x1xf32> to vector<2x16xf32>
    %76 = arith.mulf %67, %75 : vector<2x16xf32>
    %c0_41 = arith.constant 0 : index
    %c0_42 = arith.constant 0 : index
    %77 = vector.load %arg9[%c0_41, %c0_42] : memref<2x16xf32, #tpu.memory_space<vmem>>, vector<1x16xf32>
    %78 = vector.broadcast %77 : vector<1x16xf32> to vector<2x16xf32>
    %79 = arith.mulf %76, %78 : vector<2x16xf32>
    %c1 = arith.constant 1 : index
    %c0_43 = arith.constant 0 : index
    %80 = vector.load %arg9[%c1, %c0_43] : memref<2x16xf32, #tpu.memory_space<vmem>>, vector<1x16xf32>
    %81 = vector.broadcast %80 : vector<1x16xf32> to vector<2x16xf32>
    %82 = arith.addf %79, %81 : vector<2x16xf32>
    %cst_44 = arith.constant 0.000000e+00 : f32
    %83 = vector.broadcast %cst_44 : f32 to vector<2x16xf32>
    %84 = arith.cmpf ogt, %82, %83 : vector<2x16xf32>
    %cst_45 = arith.constant 2.000000e-01 : f32
    %85 = vector.broadcast %cst_45 : f32 to vector<2x16xf32>
    %86 = arith.mulf %85, %82 : vector<2x16xf32>
    %87 = arith.select %84, %82, %86 : vector<2x16xi1>, vector<2x16xf32>
    %c0_46 = arith.constant 0 : index
    %c0_47 = arith.constant 0 : index
    %88 = vector.load %arg10[%c0_46, %c0_47] : memref<16x128xf32, #tpu.memory_space<vmem>>, vector<16x128xf32>
    %cst_48 = arith.constant dense<0.000000e+00> : vector<2x128xf32>
    %89 = tpu.matmul %56, %88, %cst_48 {dimension_numbers = #tpu.dot_dimension_numbers<[1], [0], [0], [1], [0, 0, 1, 1], [], []>} : vector<2x16xf32>, vector<16x128xf32>, vector<2x128xf32> -> vector<2x128xf32>
    %c0_49 = arith.constant 0 : index
    %c0_50 = arith.constant 0 : index
    %90 = vector.load %arg11[%c0_49, %c0_50] : memref<16x128xf32, #tpu.memory_space<vmem>>, vector<16x128xf32>
    %cst_51 = arith.constant dense<0.000000e+00> : vector<2x128xf32>
    %91 = tpu.matmul %87, %90, %cst_51 {dimension_numbers = #tpu.dot_dimension_numbers<[1], [0], [0], [1], [0, 0, 1, 1], [], []>} : vector<2x16xf32>, vector<16x128xf32>, vector<2x128xf32> -> vector<2x128xf32>
    %92 = arith.addf %89, %91 : vector<2x128xf32>
    %c0_52 = arith.constant 0 : index
    %c0_53 = arith.constant 0 : index
    %93 = vector.load %arg12[%c0_52, %c0_53] : memref<1x128xf32, #tpu.memory_space<vmem>>, vector<1x128xf32>
    %94 = vector.broadcast %93 : vector<1x128xf32> to vector<2x128xf32>
    %95 = arith.addf %92, %94 : vector<2x128xf32>
    %c0_54 = arith.constant 0 : index
    %c0_55 = arith.constant 0 : index
    %96 = vector.load %arg13[%c0_54, %c0_55] : memref<2x128xf32, #tpu.memory_space<vmem>>, vector<2x128xf32>
    tpu.vector_store %arg13[%c0_54, %c0_55], %95 {strides = array<i32>} : memref<2x128xf32, #tpu.memory_space<vmem>>, vector<2x128xf32>,
    return
  }
  func.func @transform_0(%arg0: i32) -> (i32, i32) {
    %c0_i32 = arith.constant 0 : i32
    %c0_i32_0 = arith.constant 0 : i32
    return %arg0, %c0_i32 : i32, i32
  }
  func.func @transform_1(%arg0: i32) -> (i32, i32) {
    %c0_i32 = arith.constant 0 : i32
    %c0_i32_0 = arith.constant 0 : i32
    %c0_i32_1 = arith.constant 0 : i32
    return %c0_i32, %c0_i32_0 : i32, i32
  }
  func.func @transform_2(%arg0: i32) -> (i32, i32) {
    %c0_i32 = arith.constant 0 : i32
    %c0_i32_0 = arith.constant 0 : i32
    %c0_i32_1 = arith.constant 0 : i32
    return %c0_i32, %c0_i32_0 : i32, i32
  }
  func.func @transform_3(%arg0: i32) -> (i32, i32) {
    %c0_i32 = arith.constant 0 : i32
    %c0_i32_0 = arith.constant 0 : i32
    %c0_i32_1 = arith.constant 0 : i32
    return %c0_i32, %c0_i32_0 : i32, i32
  }
  func.func @transform_4(%arg0: i32) -> (i32, i32) {
    %c0_i32 = arith.constant 0 : i32
    %c0_i32_0 = arith.constant 0 : i32
    %c0_i32_1 = arith.constant 0 : i32
    return %c0_i32, %c0_i32_0 : i32, i32
  }
  func.func @transform_5(%arg0: i32) -> (i32, i32) {
    %c0_i32 = arith.constant 0 : i32
    %c0_i32_0 = arith.constant 0 : i32
    %c0_i32_1 = arith.constant 0 : i32
    return %c0_i32, %c0_i32_0 : i32, i32
  }
  func.func @transform_6(%arg0: i32) -> (i32, i32) {
    %c0_i32 = arith.constant 0 : i32
    %c0_i32_0 = arith.constant 0 : i32
    %c0_i32_1 = arith.constant 0 : i32
    return %c0_i32, %c0_i32_0 : i32, i32
  }
  func.func @transform_7(%arg0: i32) -> (i32, i32) {
    %c0_i32 = arith.constant 0 : i32
    %c0_i32_0 = arith.constant 0 : i32
    %c0_i32_1 = arith.constant 0 : i32
    return %c0_i32, %c0_i32_0 : i32, i32
  }
  func.func @transform_8(%arg0: i32) -> (i32, i32) {
    %c0_i32 = arith.constant 0 : i32
    %c0_i32_0 = arith.constant 0 : i32
    %c0_i32_1 = arith.constant 0 : i32
    return %c0_i32, %c0_i32_0 : i32, i32
  }
  func.func @transform_9(%arg0: i32) -> (i32, i32) {
    %c0_i32 = arith.constant 0 : i32
    %c0_i32_0 = arith.constant 0 : i32
    %c0_i32_1 = arith.constant 0 : i32
    return %c0_i32, %c0_i32_0 : i32, i32
  }
  func.func @transform_10(%arg0: i32) -> (i32, i32) {
    %c0_i32 = arith.constant 0 : i32
    %c0_i32_0 = arith.constant 0 : i32
    %c0_i32_1 = arith.constant 0 : i32
    return %c0_i32, %c0_i32_0 : i32, i32
  }
  func.func @transform_11(%arg0: i32) -> (i32, i32) {
    %c0_i32 = arith.constant 0 : i32
    %c0_i32_0 = arith.constant 0 : i32
    %c0_i32_1 = arith.constant 0 : i32
    return %c0_i32, %c0_i32_0 : i32, i32
  }
  func.func @transform_12(%arg0: i32) -> (i32, i32) {
    %c0_i32 = arith.constant 0 : i32
    %c0_i32_0 = arith.constant 0 : i32
    return %arg0, %c0_i32 : i32, i32
  }
}

</mosaic_0001>

<bundles_post_ra>
// kernel: discriminator_forward.1
= control target key start
LH: loop header
LB: loop body
LE: loop exit
PB: predicated region body
PF: predicated region fallthrough
CT: control target
= control target key end

     0   :  { %17 = vsyncpa [#allocation3], 0  ;;  %s4422_s0 = inlined_call_operand.vmem [shape: f32[2,256], index: 0, kind: input, shape index: {}]   ;;  %s4423_s1 = inlined_call_operand.vmem [shape: bf16[256,512], index: 1, kind: input, shape index: {}]   ;;  %s4424_s2 = inlined_call_operand.vmem [shape: bf16[512,256], index: 2, kind: input, shape index: {}]   ;;  %s4425_s3 = inlined_call_operand.vmem [shape: f32[512,8], index: 3, kind: input, shape index: {}]   ;;  %s4426_s4 = inlined_call_operand.vmem [shape: f32[8,512], index: 4, kind: input, shape index: {}]   ;;  %s4427_s5 = inlined_call_operand.vmem [shape: f32[256,16], index: 5, kind: input, shape index: {}]   ;;  %s4428_s6 = inlined_call_operand.vmem [shape: f32[16,256], index: 6, kind: input, shape index: {}]   ;;  %s4429_s7 = inlined_call_operand.vmem [shape: f32[256,16], index: 7, kind: input, shape index: {}]   ;;  %s4430_s8 = inlined_call_operand.vmem [shape: f32[2,16], index: 8, kind: input, shape index: {}]   ;;  %s4431_s9 = inlined_call_operand.hbm [shape: f32[16,128], index: 9, kind: input, shape index: {}]   ;;  %s4432_s10 = inlined_call_operand.hbm [shape: f32[16,128], index: 10, kind: input, shape index: {}]   ;;  %s4433_s11 = inlined_call_operand.hbm [shape: f32[1,128], index: 11, kind: input, shape index: {}]   ;;  %s4434_s12 = inlined_call_operand.vmem [shape: f32[2,128], index: 12, kind: output, shape index: {}]  }
   0x1   :  { %18 = vsyncpa [#allocation5], 0  ;;  %s3267_s21 = smov [#allocation4]   ;;  %s3268_s23 = smov [#allocation2]  }
   0x2   :  { %s54_s22 = sshll.u32 %s3267_s21, 4  ;;  %s42_s24 = sshll.u32 %s3268_s23, 4  ;;  %s55_s22 = int_to_ptr.vmem [resolvable:$true] %s54_s22  ;;  %s3340_s24 = int_to_ptr.vmem [resolvable:$true] %s42_s24 }
   0x3   :  { %s3197_s27 = scalar_lea.hbm %s4432_s10, 256 }
   0x4   :  { %p3198_p0 = scmp.ne.s32.totalorder %s4432_s10, %s3197_s27  ;;  %p3201_p1 = scmp.lt.u32.totalorder %s3197_s27, %s4432_s10 }
   0x6   :  { %p3203_p2 = pnand %p3201_p1, %p3198_p0 }
   0x8   :  { %3206 = shalt.err (!%p3203_p2)
}
   0x9   :  { %s3207_s14 = scalar_lea.vmem %s55_s22, 256  ;;  %p3212_p4 = scmp.lt.s32.totalorder %s55_s22, %s55_s22 }
   0xa   :  { %p3208_p3 = scmp.ne.s32.totalorder %s55_s22, %s3207_s14  ;;  %p3213_p5 = scmp.lt.s32.totalorder %s3207_s14, %s3207_s14 }
   0xc   :  { %p3214_p6 = por %p3213_p5, %p3212_p4 }
   0xe   :  { %p3215_p7 = pnand %p3214_p6, %p3208_p3 }
  0x10   :  { %3218 = shalt.err (!%p3215_p7)
}
  0x11   :  { %s3269_s15 = smov 128   ;;  %s3270_s16 = smov 8  }
  0x12   :  { %60 = dma.hbm_to_vmem [thread:$0]  %s4432_s10, 256, %s55_s22, [#allocation5], %s3269_s15, %s3269_s15, %s3270_s16  }
  0x13   :  { %s3219_s21 = scalar_lea.hbm %s4431_s9, 256 }
  0x14   :  { %p3220_p8 = scmp.ne.s32.totalorder %s4431_s9, %s3219_s21  ;;  %p3223_p9 = scmp.lt.u32.totalorder %s3219_s21, %s4431_s9 }
  0x16   :  { %p3225_p10 = pnand %p3223_p9, %p3220_p8 }
  0x18   :  { %3228 = shalt.err (!%p3225_p10)
}
  0x19   :  { %s3229_s28 = scalar_lea.vmem %s3340_s24, 256  ;;  %p3234_p12 = scmp.lt.s32.totalorder %s3340_s24, %s3340_s24 }
  0x1a   :  { %p3230_p11 = scmp.ne.s32.totalorder %s3340_s24, %s3229_s28  ;;  %p3235_p13 = scmp.lt.s32.totalorder %s3229_s28, %s3229_s28 }
  0x1c   :  { %p3236_p0 = por %p3235_p13, %p3234_p12 }
  0x1e   :  { %p3237_p1 = pnand %p3236_p0, %p3230_p11 }
  0x20   :  { %3240 = shalt.err (!%p3237_p1)
}
  0x21   :  { %48 = dma.hbm_to_vmem [thread:$0]  %s4431_s9, 256, %s3340_s24, [#allocation3], %s3269_s15, %s3269_s15, %s3270_s16  }
  0x22   :  { %s3271_s29 = smov [#allocation6]   ;;  %s3241_s17 = scalar_lea.hbm %s4433_s11, 16 }
  0x23   :  { %s67_s30 = sshll.u32 %s3271_s29, 4  ;;  %p3242_p2 = scmp.ne.s32.totalorder %s4433_s11, %s3241_s17  ;;  %s68_s30 = int_to_ptr.vmem [resolvable:$true] %s67_s30 }
  0x24   :  { %p3245_p3 = scmp.lt.u32.totalorder %s3241_s17, %s4433_s11 }
  0x26   :  { %p3247_p4 = pnand %p3245_p3, %p3242_p2 }
  0x28   :  { %3250 = shalt.err (!%p3247_p4)
}
  0x29   :  { %s3251_s23 = scalar_lea.vmem %s68_s30, 16  ;;  %s3255_s9 = scalar_lea.vmem %s68_s30, 32 }
  0x2a   :  { %p3252_p5 = scmp.ne.s32.totalorder %s68_s30, %s3251_s23  ;;  %p3256_p6 = scmp.lt.s32.totalorder %s68_s30, %s68_s30 }
  0x2b   :  { %p3257_p7 = scmp.lt.s32.totalorder %s3255_s9, %s3251_s23 }
  0x2d   :  { %p3258_p8 = por %p3257_p7, %p3256_p6 }
  0x2f   :  { %p3259_p9 = pnand %p3258_p8, %p3252_p5 }
  0x31   :  { %3262 = shalt.err (!%p3259_p9)
}
  0x32   :  { %70 = dma.hbm_to_vmem [thread:$0]  %s4433_s11, 16, %s68_s30, [#allocation5]  }
  0x33   :  { %3263 = dma.done.wait [#allocation3], 256  }
  0x34   :  { %3264 = vsyncadd [#allocation3], 4294967040 }
  0x35   :  { %3265 = dma.done.wait [#allocation5], 272  }
  0x36   :  { %3266 = vsyncadd [#allocation5], 4294967024  ;;  %v2999_v0 = vld [vmem:[%s4423_s1 + $0x4] ss:$16 sps:$4 sm:$0xff]   ;;  %v3001_v1 = vld [vmem:[%s4423_s1 + $0xc] ss:$16 sps:$4 sm:$0xff]  }
  0x37   :  { %478 = vmatprep.subr.bf16.mxu0 %v2999_v0  ;;  %v3003_v2 = vld [vmem:[%s4423_s1] ss:$16 sps:$4 sm:$0xff]   ;;  %v3004_v3 = vld [vmem:[%s4423_s1 + $0x8] ss:$16 sps:$4 sm:$0xff]   ;;  %519 = vmatprep.subr.bf16.mxu1 %v3001_v1  ;;  %v3005_v4 = vld [vmem:[%s4423_s1 + $0x24] ss:$16 sps:$4 sm:$0xff]  }
  0x38   :  { %479 = vmatpush1.bf16.msra.mxu0 %v3003_v2  ;;  %520 = vmatpush1.bf16.msra.mxu1 %v3004_v3  ;;  %v3007_v5 = vld [vmem:[%s4423_s1 + $0x2c] ss:$16 sps:$4 sm:$0xff]   ;;  %v3009_v6 = vld [vmem:[%s4423_s1 + $0x20] ss:$16 sps:$4 sm:$0xff]   ;;  %v3010_v7 = vld [vmem:[%s4423_s1 + $0x28] ss:$16 sps:$4 sm:$0xff]  }
  0x39   :  { %480 = vmatprep.subr.bf16.mxu0 %v3005_v4  ;;  %521 = vmatprep.subr.bf16.mxu1 %v3007_v5  ;;  %v3011_v8 = vld [vmem:[%s4423_s1 + $0x44] ss:$16 sps:$4 sm:$0xff]   ;;  %v3013_v9 = vld [vmem:[%s4423_s1 + $0x4c] ss:$16 sps:$4 sm:$0xff]   ;;  %v3015_v10 = vld [vmem:[%s4423_s1 + $0x40] ss:$16 sps:$4 sm:$0xff]  }
  0x3a   :  { %v3016_v11 = vld [vmem:[%s4423_s1 + $0x48] ss:$16 sps:$4 sm:$0xff]   ;;  %v3017_v12 = vld [vmem:[%s4423_s1 + $0x64] ss:$16 sps:$4 sm:$0xff]   ;;  %v3019_v13 = vld [vmem:[%s4423_s1 + $0x6c] ss:$16 sps:$4 sm:$0xff]  }
  0x3b   :  { %v3021_v14 = vld [vmem:[%s4423_s1 + $0x60] ss:$16 sps:$4 sm:$0xff]   ;;  %v3022_v15 = vld [vmem:[%s4423_s1 + $0x68] ss:$16 sps:$4 sm:$0xff]   ;;  %v3023_v16 = vld [vmem:[%s4423_s1 + $0x84] ss:$16 sps:$4 sm:$0xff]  }
  0x3c   :  { %481 = vmatpush1.bf16.msra.mxu0 %v3009_v6  ;;  %522 = vmatpush1.bf16.msra.mxu1 %v3010_v7  ;;  %v3025_v17 = vld [vmem:[%s4423_s1 + $0x8c] ss:$16 sps:$4 sm:$0xff]   ;;  %v3027_v18 = vld [vmem:[%s4423_s1 + $0x80] ss:$16 sps:$4 sm:$0xff]   ;;  %v3028_v19 = vld [vmem:[%s4423_s1 + $0x88] ss:$16 sps:$4 sm:$0xff]  }
  0x3d   :  { %482 = vmatprep.subr.bf16.mxu0 %v3011_v8  ;;  %523 = vmatprep.subr.bf16.mxu1 %v3013_v9  ;;  %v3029_v20 = vld [vmem:[%s4423_s1 + $0xa4] ss:$16 sps:$4 sm:$0xff]   ;;  %v3031_v21 = vld [vmem:[%s4423_s1 + $0xac] ss:$16 sps:$4 sm:$0xff]   ;;  %v3033_v22 = vld [vmem:[%s4423_s1 + $0xa0] ss:$16 sps:$4 sm:$0xff]  }
  0x3e   :  { %v3034_v23 = vld [vmem:[%s4423_s1 + $0xa8] ss:$16 sps:$4 sm:$0xff]   ;;  %v3035_v24 = vld [vmem:[%s4423_s1 + $0xc4] ss:$16 sps:$4 sm:$0xff]   ;;  %v3037_v25 = vld [vmem:[%s4423_s1 + $0xcc] ss:$16 sps:$4 sm:$0xff]  }
  0x3f   :  { %v3039_v26 = vld [vmem:[%s4423_s1 + $0xc0] ss:$16 sps:$4 sm:$0xff]   ;;  %v3040_v27 = vld [vmem:[%s4423_s1 + $0xc8] ss:$16 sps:$4 sm:$0xff]   ;;  %v3041_v28 = vld [vmem:[%s4423_s1 + $0xe4] ss:$16 sps:$4 sm:$0xff]  }
  0x40   :  { %483 = vmatpush1.bf16.msra.mxu0 %v3015_v10  ;;  %524 = vmatpush1.bf16.msra.mxu1 %v3016_v11  ;;  %v3043_v29 = vld [vmem:[%s4423_s1 + $0xec] ss:$16 sps:$4 sm:$0xff]   ;;  %v3045_v30 = vld [vmem:[%s4423_s1 + $0xe0] ss:$16 sps:$4 sm:$0xff]   ;;  %v3046_v31 = vld [vmem:[%s4423_s1 + $0xe8] ss:$16 sps:$4 sm:$0xff]  }
  0x41   :  { %484 = vmatprep.subr.bf16.mxu0 %v3017_v12  ;;  %525 = vmatprep.subr.bf16.mxu1 %v3019_v13  ;;  %v3047_v32 = vld [vmem:[%s4423_s1 + $0x104] ss:$16 sps:$4 sm:$0xff]   ;;  %v3049_v33 = vld [vmem:[%s4423_s1 + $0x10c] ss:$16 sps:$4 sm:$0xff]   ;;  %v3051_v34 = vld [vmem:[%s4423_s1 + $0x100] ss:$16 sps:$4 sm:$0xff]  }
  0x42   :  { %v3052_v35 = vld [vmem:[%s4423_s1 + $0x108] ss:$16 sps:$4 sm:$0xff]   ;;  %v3053_v36 = vld [vmem:[%s4423_s1 + $0x124] ss:$16 sps:$4 sm:$0xff]   ;;  %v3055_v37 = vld [vmem:[%s4423_s1 + $0x12c] ss:$16 sps:$4 sm:$0xff]  }
  0x43   :  { %v3057_v38 = vld [vmem:[%s4423_s1 + $0x120] ss:$16 sps:$4 sm:$0xff]   ;;  %v3058_v39 = vld [vmem:[%s4423_s1 + $0x128] ss:$16 sps:$4 sm:$0xff]   ;;  %v3059_v40 = vld [vmem:[%s4423_s1 + $0x144] ss:$16 sps:$4 sm:$0xff]  }
  0x44   :  { %485 = vmatpush1.bf16.msra.mxu0 %v3021_v14  ;;  %526 = vmatpush1.bf16.msra.mxu1 %v3022_v15  ;;  %v3061_v41 = vld [vmem:[%s4423_s1 + $0x14c] ss:$16 sps:$4 sm:$0xff]   ;;  %v3063_v42 = vld [vmem:[%s4423_s1 + $0x140] ss:$16 sps:$4 sm:$0xff]   ;;  %v3064_v43 = vld [vmem:[%s4423_s1 + $0x148] ss:$16 sps:$4 sm:$0xff]  }
  0x45   :  { %486 = vmatprep.subr.bf16.mxu0 %v3023_v16  ;;  %527 = vmatprep.subr.bf16.mxu1 %v3025_v17  ;;  %v3065_v44 = vld [vmem:[%s4423_s1 + $0x164] ss:$16 sps:$4 sm:$0xff]   ;;  %v3067_v45 = vld [vmem:[%s4423_s1 + $0x16c] ss:$16 sps:$4 sm:$0xff]   ;;  %v3069_v47 = vld [vmem:[%s4423_s1 + $0x160] ss:$16 sps:$4 sm:$0xff]  }
  0x46   :  { %v2344_v46 = vld.sshfl [vmem:[%s4422_s0] sm:$0x33 pattern:$0x76325410]  ;;  %v3070_v48 = vld [vmem:[%s4423_s1 + $0x168] ss:$16 sps:$4 sm:$0xff]  }
  0x47   :  { %v89_v49 = vcombine.high %v2344_v46, %v2344_v46  ;;  %v3071_v50 = vld [vmem:[%s4423_s1 + $0x184] ss:$16 sps:$4 sm:$0xff]   ;;  %v3073_v51 = vld [vmem:[%s4423_s1 + $0x18c] ss:$16 sps:$4 sm:$0xff]   ;;  %v3075_v53 = vld [vmem:[%s4423_s1 + $0x180] ss:$16 sps:$4 sm:$0xff]   ;;  %v92_v17 = vpack.c.bf16 %v2344_v46, %v2344_v46 }
  0x48   :  { %487 = vmatpush1.bf16.msra.mxu0 %v3027_v18  ;;  %528 = vmatpush1.bf16.msra.mxu1 %v3028_v19  ;;  %v3076_v54 = vld [vmem:[%s4423_s1 + $0x188] ss:$16 sps:$4 sm:$0xff]   ;;  %v3077_v55 = vld [vmem:[%s4423_s1 + $0x1a4] ss:$16 sps:$4 sm:$0xff]   ;;  %v3079_v56 = vld [vmem:[%s4423_s1 + $0x1ac] ss:$16 sps:$4 sm:$0xff]  }
  0x49   :  { %488 = vmatprep.subr.bf16.mxu0 %v3029_v20  ;;  %529 = vmatprep.subr.bf16.mxu1 %v3031_v21  ;;  %v93_v52 = vpack.c.bf16 %v89_v49, %v89_v49  ;;  %v3081_v57 = vld [vmem:[%s4423_s1 + $0x1a0] ss:$16 sps:$4 sm:$0xff]   ;;  %v3082_v58 = vld [vmem:[%s4423_s1 + $0x1a8] ss:$16 sps:$4 sm:$0xff]   ;;  %v3083_v59 = vld [vmem:[%s4423_s1 + $0x1c4] ss:$16 sps:$4 sm:$0xff]  }
  0x4a   :  { %v3085_v60 = vld [vmem:[%s4423_s1 + $0x1cc] ss:$16 sps:$4 sm:$0xff]   ;;  %v3087_v61 = vld [vmem:[%s4423_s1 + $0x1c0] ss:$16 sps:$4 sm:$0xff]   ;;  %v3088_v62 = vld [vmem:[%s4423_s1 + $0x1c8] ss:$16 sps:$4 sm:$0xff]  }
  0x4b   :  { %510 = vmatprep.mubr.bf16.mxu0 %v93_v52  ;;  %551 = vmatprep.mubr.bf16.mxu1 %v93_v52  ;;  %v3089_v63 = vld [vmem:[%s4423_s1 + $0x1e4] ss:$16 sps:$4 sm:$0xff]   ;;  %v3091_v0 = vld [vmem:[%s4423_s1 + $0x1ec] ss:$16 sps:$4 sm:$0xff]   ;;  %v3093_v5 = vld [vmem:[%s4423_s1 + $0x1e0] ss:$16 sps:$4 sm:$0xff]  }
  0x4c   :  { %489 = vmatpush1.bf16.msra.mxu0 %v3033_v22  ;;  %530 = vmatpush1.bf16.msra.mxu1 %v3034_v23  ;;  %v576_v1 = vld [vmem:[%s4425_s3 + $0x80] sm:$0xff]  ;;  %v577_v2 = vld [vmem:[%s4425_s3 + $0x88] sm:$0xff]  ;;  %v578_v13 = vld [vmem:[%s4425_s3 + $0x90] sm:$0xff]  ;;  %vm917_vm0 = vcmask 64512   ;;  %vm1883_vm5 = vcmask 130048   ;;  %vm2146_vm8 = vcmask 123904  }
  0x4d   :  { %490 = vmatprep.subr.bf16.mxu0 %v3035_v24  ;;  %531 = vmatprep.subr.bf16.mxu1 %v3037_v25  ;;  %v608_v3 = vld [vmem:[%s4425_s3 + $0x180] sm:$0xff]  ;;  %v609_v4 = vld [vmem:[%s4425_s3 + $0x188] sm:$0xff]  ;;  %v3596_v9 = vpack.c.bf16 %v577_v2, %v576_v1  ;;  %v579_v14 = vld [vmem:[%s4425_s3 + $0x98] sm:$0xff]  ;;  %vm3274_vm9 = vmmov 0  }
  0x4e   :  { %v3094_v6 = vld [vmem:[%s4423_s1 + $0x1e8] ss:$16 sps:$4 sm:$0xff]   ;;  %v560_v7 = vld [vmem:[%s4425_s3] sm:$0xff]  ;;  %v3598_v10 = vpack.c.bf16 %v609_v4, %v608_v3  ;;  %v610_v15 = vld [vmem:[%s4425_s3 + $0x190] sm:$0xff] }
  0x4f   :  { %v561_v8 = vld [vmem:[%s4425_s3 + $0x8] sm:$0xff]  ;;  %v592_v11 = vld [vmem:[%s4425_s3 + $0x100] sm:$0xff]  ;;  %v611_v16 = vld [vmem:[%s4425_s3 + $0x198] sm:$0xff] }
  0x50   :  { %491 = vmatpush1.bf16.msra.mxu0 %v3039_v26  ;;  %532 = vmatpush1.bf16.msra.mxu1 %v3040_v27  ;;  %v593_v12 = vld [vmem:[%s4425_s3 + $0x108] sm:$0xff]  ;;  %v562_v18 = vld [vmem:[%s4425_s3 + $0x10] sm:$0xff]  ;;  %v563_v19 = vld [vmem:[%s4425_s3 + $0x18] sm:$0xff]  ;;  %v3630_v22 = vpack.c.bf16 %v561_v8, %v560_v7 }
  0x51   :  { %492 = vmatprep.subr.bf16.mxu0 %v3041_v28  ;;  %533 = vmatprep.subr.bf16.mxu1 %v3043_v29  ;;  %v594_v20 = vld [vmem:[%s4425_s3 + $0x110] sm:$0xff]  ;;  %v595_v21 = vld [vmem:[%s4425_s3 + $0x118] sm:$0xff]  ;;  %v3632_v23 = vpack.c.bf16 %v593_v12, %v592_v11  ;;  %v580_v24 = vld [vmem:[%s4425_s3 + $0xa0] sm:$0xff]  ;;  %v3648_v28 = vpack.c.bf16 %v579_v14, %v578_v13  ;;  %v3650_v29 = vpack.c.bf16 %v611_v16, %v610_v15 }
  0x52   :  { %v581_v25 = vld [vmem:[%s4425_s3 + $0xa8] sm:$0xff]  ;;  %v612_v26 = vld [vmem:[%s4425_s3 + $0x1a0] sm:$0xff]  ;;  %v570_v2 = vld [vmem:[%s4425_s3 + $0x50] sm:$0xff] }
  0x53   :  { %v613_v27 = vld [vmem:[%s4425_s3 + $0x1a8] sm:$0xff]  ;;  %v571_v3 = vld [vmem:[%s4425_s3 + $0x58] sm:$0xff]  ;;  %v602_v4 = vld [vmem:[%s4425_s3 + $0x150] sm:$0xff] }
  0x54   :  { %493 = vmatpush1.bf16.msra.mxu0 %v3045_v30  ;;  %534 = vmatpush1.bf16.msra.mxu1 %v3046_v31  ;;  %v564_v30 = vld [vmem:[%s4425_s3 + $0x20] sm:$0xff]  ;;  %v565_v31 = vld [vmem:[%s4425_s3 + $0x28] sm:$0xff] }
  0x55   :  { %494 = vmatprep.subr.bf16.mxu0 %v3047_v32  ;;  %535 = vmatprep.subr.bf16.mxu1 %v3049_v33  ;;  %v596_v32 = vld [vmem:[%s4425_s3 + $0x120] sm:$0xff]  ;;  %v597_v33 = vld [vmem:[%s4425_s3 + $0x128] sm:$0xff]  ;;  %v3702_v46 = vpack.c.bf16 %v565_v31, %v564_v30  ;;  %v622_v30 = vld [vmem:[%s4425_s3 + $0x1f0] sm:$0xff] }
  0x56   :  { %v585_v49 = vld [vmem:[%s4425_s3 + $0xc8] sm:$0xff]  ;;  %v588_v8 = vld [vmem:[%s4425_s3 + $0xe0] sm:$0xff]  ;;  %v623_v31 = vld [vmem:[%s4425_s3 + $0x1f8] sm:$0xff] }
  0x57   :  { %v589_v11 = vld [vmem:[%s4425_s3 + $0xe8] sm:$0xff]  ;;  %v620_v12 = vld [vmem:[%s4425_s3 + $0x1e0] sm:$0xff] }
  0x58   :  { %495 = vmatpush1.bf16.msra.mxu0 %v3051_v34  ;;  %536 = vmatpush1.bf16.msra.mxu1 %v3052_v35  ;;  %v3666_v34 = vpack.c.bf16 %v563_v19, %v562_v18  ;;  %v3668_v35 = vpack.c.bf16 %v595_v21, %v594_v20  ;;  %v621_v13 = vld [vmem:[%s4425_s3 + $0x1e8] sm:$0xff]  ;;  %v572_v16 = vld [vmem:[%s4425_s3 + $0x60] sm:$0xff]  ;;  %v3810_v20 = vpack.c.bf16 %v571_v3, %v570_v2  ;;  %v3118_v2 = vld [vmem:[%s4424_s2 + $0x74] ss:$8 sps:$4 sm:$0xff]  }
  0x59   :  { %496 = vmatprep.subr.bf16.mxu0 %v3053_v36  ;;  %537 = vmatprep.subr.bf16.mxu1 %v3055_v37  ;;  %v582_v36 = vld [vmem:[%s4425_s3 + $0xb0] sm:$0xff]  ;;  %v583_v37 = vld [vmem:[%s4425_s3 + $0xb8] sm:$0xff]  ;;  %v604_v18 = vld [vmem:[%s4425_s3 + $0x160] sm:$0xff] }
  0x5a   :  { %v3720_v52 = vpack.c.bf16 %v583_v37, %v582_v36  ;;  %v605_v19 = vld [vmem:[%s4425_s3 + $0x168] sm:$0xff]  ;;  %v574_v36 = vld [vmem:[%s4425_s3 + $0x70] sm:$0xff] }
  0x5b   :  { %v3116_v3 = vld [vmem:[%s4424_s2 + $0x70] ss:$8 sps:$4 sm:$0xff]  }
  0x5c   :  { %497 = vmatpush1.bf16.msra.mxu0 %v3057_v38  ;;  %538 = vmatpush1.bf16.msra.mxu1 %v3058_v39  ;;  %v614_v38 = vld [vmem:[%s4425_s3 + $0x1b0] sm:$0xff]  ;;  %v615_v39 = vld [vmem:[%s4425_s3 + $0x1b8] sm:$0xff] }
  0x5d   :  { %498 = vmatprep.subr.bf16.mxu0 %v3059_v40  ;;  %539 = vmatprep.subr.bf16.mxu1 %v3061_v41  ;;  %v3684_v40 = vpack.c.bf16 %v581_v25, %v580_v24  ;;  %v3686_v41 = vpack.c.bf16 %v613_v27, %v612_v26  ;;  %v3816_v24 = vpack.c.bf16 %v589_v11, %v588_v8  ;;  %v590_v26 = vld [vmem:[%s4425_s3 + $0xf0] sm:$0xff]  ;;  %v591_v27 = vld [vmem:[%s4425_s3 + $0xf8] sm:$0xff]  ;;  %v3127_v8 = vld [vmem:[%s4424_s2 + $0xa4] ss:$8 sps:$4 sm:$0xff]  }
  0x5e   :  { %v3818_v25 = vpack.c.bf16 %v621_v13, %v620_v12  ;;  %v2777_v37 = vpack.c.bf16 %v591_v27, %v590_v26  ;;  %v3125_v11 = vld [vmem:[%s4424_s2 + $0xa0] ss:$8 sps:$4 sm:$0xff]   ;;  %v3130_v12 = vld [vmem:[%s4424_s2 + $0xb4] ss:$8 sps:$4 sm:$0xff]   ;;  %v3128_v13 = vld [vmem:[%s4424_s2 + $0xb0] ss:$8 sps:$4 sm:$0xff]  }
  0x60   :  { %499 = vmatpush1.bf16.msra.mxu0 %v3063_v42  ;;  %540 = vmatpush1.bf16.msra.mxu1 %v3064_v43  ;;  %v566_v42 = vld [vmem:[%s4425_s3 + $0x30] sm:$0xff]  ;;  %v567_v43 = vld [vmem:[%s4425_s3 + $0x38] sm:$0xff] }
  0x61   :  { %500 = vmatprep.subr.bf16.mxu0 %v3065_v44  ;;  %541 = vmatprep.subr.bf16.mxu1 %v3067_v45  ;;  %v598_v44 = vld [vmem:[%s4425_s3 + $0x130] sm:$0xff]  ;;  %v599_v45 = vld [vmem:[%s4425_s3 + $0x138] sm:$0xff] }
  0x64   :  { %501 = vmatpush1.bf16.msra.mxu0 %v3069_v47  ;;  %542 = vmatpush1.bf16.msra.mxu1 %v3070_v48  ;;  %v3704_v47 = vpack.c.bf16 %v597_v33, %v596_v32  ;;  %v584_v48 = vld [vmem:[%s4425_s3 + $0xc0] sm:$0xff]  ;;  %v2807_v33 = vpack.c.bf16 %v605_v19, %v604_v18 }
  0x65   :  { %502 = vmatprep.subr.bf16.mxu0 %v3071_v50  ;;  %543 = vmatprep.subr.bf16.mxu1 %v3073_v51  ;;  %v616_v50 = vld [vmem:[%s4425_s3 + $0x1c0] sm:$0xff]  ;;  %v617_v51 = vld [vmem:[%s4425_s3 + $0x1c8] sm:$0xff] }
  0x66   :  { %v3758_v1 = vpack.c.bf16 %v617_v51, %v616_v50 }
  0x68   :  { %503 = vmatpush1.bf16.msra.mxu0 %v3075_v53  ;;  %544 = vmatpush1.bf16.msra.mxu1 %v3076_v54  ;;  %v3722_v53 = vpack.c.bf16 %v615_v39, %v614_v38  ;;  %v568_v54 = vld [vmem:[%s4425_s3 + $0x40] sm:$0xff]  ;;  %v2809_v38 = vpack.c.bf16 %v623_v31, %v622_v30  ;;  %v575_v39 = vld [vmem:[%s4425_s3 + $0x78] sm:$0xff] }
  0x69   :  { %504 = vmatprep.subr.bf16.mxu0 %v3077_v55  ;;  %545 = vmatprep.subr.bf16.mxu1 %v3079_v56  ;;  %v569_v55 = vld [vmem:[%s4425_s3 + $0x48] sm:$0xff]  ;;  %v600_v56 = vld [vmem:[%s4425_s3 + $0x140] sm:$0xff] }
  0x6c   :  { %505 = vmatpush1.bf16.msra.mxu0 %v3081_v57  ;;  %546 = vmatpush1.bf16.msra.mxu1 %v3082_v58  ;;  %v601_v57 = vld [vmem:[%s4425_s3 + $0x148] sm:$0xff]  ;;  %v3738_v58 = vpack.c.bf16 %v567_v43, %v566_v42  ;;  %v606_v42 = vld [vmem:[%s4425_s3 + $0x170] sm:$0xff]  ;;  %v607_v43 = vld [vmem:[%s4425_s3 + $0x178] sm:$0xff] }
  0x6d   :  { %506 = vmatprep.subr.bf16.mxu0 %v3083_v59  ;;  %547 = vmatprep.subr.bf16.mxu1 %v3085_v60  ;;  %v3740_v59 = vpack.c.bf16 %v599_v45, %v598_v44  ;;  %v586_v60 = vld [vmem:[%s4425_s3 + $0xd0] sm:$0xff]  ;;  %v3776_v7 = vpack.c.bf16 %v601_v57, %v600_v56  ;;  %v2779_v44 = vpack.c.bf16 %v575_v39, %v574_v36 }
  0x6e   :  { %v2811_v45 = vpack.c.bf16 %v607_v43, %v606_v42  ;;  %v626_v39 = vld [vmem:[%s4426_s4 + $0x10] sm:$0xff] }
  0x70   :  { %507 = vmatpush1.bf16.msra.mxu0 %v3087_v61  ;;  %548 = vmatpush1.bf16.msra.mxu1 %v3088_v62  ;;  %v587_v61 = vld [vmem:[%s4425_s3 + $0xd8] sm:$0xff]  ;;  %v618_v62 = vld [vmem:[%s4425_s3 + $0x1d0] sm:$0xff] }
  0x71   :  { %508 = vmatprep.subr.bf16.mxu0 %v3089_v63  ;;  %549 = vmatprep.subr.bf16.mxu1 %v3091_v0  ;;  %v619_v63 = vld [vmem:[%s4425_s3 + $0x1d8] sm:$0xff]  ;;  %v3756_v0 = vpack.c.bf16 %v585_v49, %v584_v48  ;;  %v3792_v14 = vpack.c.bf16 %v587_v61, %v586_v60  ;;  %v3109_v60 = vld [vmem:[%s4424_s2 + $0x44] ss:$8 sps:$4 sm:$0xff]   ;;  %v3107_v61 = vld [vmem:[%s4424_s2 + $0x40] ss:$8 sps:$4 sm:$0xff]  }
  0x72   :  { %v3794_v15 = vpack.c.bf16 %v619_v63, %v618_v62  ;;  %v3112_v62 = vld [vmem:[%s4424_s2 + $0x54] ss:$8 sps:$4 sm:$0xff]   ;;  %v3110_v63 = vld [vmem:[%s4424_s2 + $0x50] ss:$8 sps:$4 sm:$0xff]  }
  0x74   :  { %509 = vmatpush1.bf16.msra.mxu0 %v3093_v5  ;;  %550 = vmatpush1.bf16.msra.mxu1 %v3094_v6  ;;  %v603_v5 = vld [vmem:[%s4425_s3 + $0x158] sm:$0xff]  ;;  %v3774_v6 = vpack.c.bf16 %v569_v55, %v568_v54 }
  0x75   :  { %2750 = vmatprep.subr.bf16.mxu0 %v3596_v9  ;;  %2782 = vmatprep.subr.bf16.mxu1 %v3598_v10  ;;  %v3812_v21 = vpack.c.bf16 %v603_v5, %v602_v4  ;;  %v3121_v4 = vld [vmem:[%s4424_s2 + $0x84] ss:$8 sps:$4 sm:$0xff]   ;;  %v3119_v5 = vld [vmem:[%s4424_s2 + $0x80] ss:$8 sps:$4 sm:$0xff]  }
  0x77   :  { %511 = vmatmul.mubr.bf16.vlgmr.msra.gmra.mrb[0].mxu0 %v92_v17  ;;  %552 = vmatmul.mubr.bf16.vlgmr.msra.gmra.mrb[0].mxu1 %v92_v17  ;;  %v573_v17 = vld [vmem:[%s4425_s3 + $0x68] sm:$0xff] }
  0x78   :  { %2752 = vmatpush3.bf16.msra.mxu0 %v3630_v22  ;;  %2784 = vmatpush3.bf16.msra.mxu1 %v3632_v23  ;;  %v2775_v32 = vpack.c.bf16 %v573_v17, %v572_v16 }
  0x79   :  { %2754 = vmatprep.subr.bf16.mxu0 %v3648_v28  ;;  %2786 = vmatprep.subr.bf16.mxu1 %v3650_v29 }
  0x7c   :  { %2756 = vmatpush3.bf16.msra.mxu0 %v3666_v34  ;;  %2788 = vmatpush3.bf16.msra.mxu1 %v3668_v35 }
  0x7d   :  { %2758 = vmatprep.subr.bf16.mxu0 %v3684_v40  ;;  %2790 = vmatprep.subr.bf16.mxu1 %v3686_v41 }
  0x80   :  { %2760 = vmatpush3.bf16.msra.mxu0 %v3702_v46  ;;  %2792 = vmatpush3.bf16.msra.mxu1 %v3704_v47 }
  0x81   :  { %2762 = vmatprep.subr.bf16.mxu0 %v3720_v52  ;;  %2794 = vmatprep.subr.bf16.mxu1 %v3722_v53 }
  0x84   :  { %2764 = vmatpush3.bf16.msra.mxu0 %v3738_v58  ;;  %2796 = vmatpush3.bf16.msra.mxu1 %v3740_v59 }
  0x85   :  { %2766 = vmatprep.subr.bf16.mxu0 %v3756_v0  ;;  %2798 = vmatprep.subr.bf16.mxu1 %v3758_v1 }
  0x88   :  { %2768 = vmatpush3.bf16.msra.mxu0 %v3774_v6  ;;  %2800 = vmatpush3.bf16.msra.mxu1 %v3776_v7 }
  0x89   :  { %2770 = vmatprep.subr.bf16.mxu0 %v3792_v14  ;;  %2802 = vmatprep.subr.bf16.mxu1 %v3794_v15 }
  0x8c   :  { %2772 = vmatpush3.bf16.msra.mxu0 %v3810_v20  ;;  %2804 = vmatpush3.bf16.msra.mxu1 %v3812_v21 }
  0x8d   :  { %2774 = vmatprep.subr.bf16.mxu0 %v3816_v24  ;;  %2806 = vmatprep.subr.bf16.mxu1 %v3818_v25 }
  0x90   :  { %2776 = vmatpush3.bf16.msra.mxu0 %v2775_v32  ;;  %2808 = vmatpush3.bf16.msra.mxu1 %v2807_v33 }
  0x91   :  { %2778 = vmatprep.subr.bf16.mxu0 %v2777_v37  ;;  %2810 = vmatprep.subr.bf16.mxu1 %v2809_v38 }
  0x94   :  { %2780 = vmatpush3.bf16.msra.mxu0 %v2779_v44  ;;  %2812 = vmatpush3.bf16.msra.mxu1 %v2811_v45 }
  0x95   :  { %2814 = vmatprep.subr.bf16.mxu0 %v3596_v9  ;;  %2846 = vmatprep.subr.bf16.mxu1 %v3598_v10 }
 0x14a   :  { %v3850_v48 = vpop.f32.mrb[0].mxu0  ;;  %v3852_v49 = vpop.f32.mrb[0].mxu1 }
 0x14b   :  { %v3854_v50 = vpop.f32.mrb[1].mxu0  ;;  %v3856_v51 = vpop.f32.mrb[1].mxu1 }
 0x14c   :  { %v769_v54 = vmul.f32 %v3854_v50, %v3854_v50  ;;  %v771_v55 = vmul.f32 %v3856_v51, %v3856_v51  ;;  %v516_v56 = vpop.f32.mrb[2].mxu0  ;;  %v557_v57 = vpop.f32.mrb[2].mxu1  ;;  %692 = vmatprep.mubr.f32.mxu0 %v3854_v50  ;;  %762 = vmatprep.mubr.f32.mxu1 %v3856_v51 }
 0x14d   :  { %v517_v9 = vpop.f32.mrb[3].mxu0  ;;  %v558_v10 = vpop.f32.mrb[3].mxu1  ;;  %693 = vmatmul.mubr.f32.vlgmr.msra.gmra.mrb[4].mxu0 %v3850_v48  ;;  %763 = vmatmul.mubr.f32.vlgmr.msra.gmra.mrb[4].mxu1 %v3852_v49  ;;  %v3139_v56 = vld [vmem:[%s4424_s2 + $0xe4] ss:$8 sps:$4 sm:$0xff]   ;;  %v3137_v57 = vld [vmem:[%s4424_s2 + $0xe0] ss:$8 sps:$4 sm:$0xff]  }
 0x14e   :  { %2816 = vmatpush3.bf16.msra.mxu0 %v3630_v22  ;;  %2848 = vmatpush3.bf16.msra.mxu1 %v3632_v23  ;;  %v768_v22 = vmul.f32 %v3850_v48, %v3850_v48  ;;  %v770_v23 = vmul.f32 %v3852_v49, %v3852_v49  ;;  %v3142_v9 = vld [vmem:[%s4424_s2 + $0xf4] ss:$8 sps:$4 sm:$0xff]   ;;  %v3140_v10 = vld [vmem:[%s4424_s2 + $0xf0] ss:$8 sps:$4 sm:$0xff]  }
 0x14f   :  { %836 = vmatprep.mubr.f32.mxu0 %v769_v54  ;;  %906 = vmatprep.mubr.f32.mxu1 %v771_v55  ;;  %v3136_v54 = vld [vmem:[%s4424_s2 + $0xd4] ss:$8 sps:$4 sm:$0xff]   ;;  %v3134_v55 = vld [vmem:[%s4424_s2 + $0xd0] ss:$8 sps:$4 sm:$0xff]  }
 0x150   :  { %2818 = vmatprep.subr.bf16.mxu0 %v3648_v28  ;;  %2850 = vmatprep.subr.bf16.mxu1 %v3650_v29  ;;  %v3897_v28 = vld [vmem:[%s4426_s4 + $0x8] sm:$0xff]  ;;  %v3902_v29 = vld [vmem:[%s4426_s4] sm:$0xff] }
 0x152   :  { %2820 = vmatpush3.bf16.msra.mxu0 %v3666_v34  ;;  %2852 = vmatpush3.bf16.msra.mxu1 %v3668_v35  ;;  %v3907_v34 = vld [vmem:[%s4426_s4 + $0x18] sm:$0xff]  ;;  %v3272_v35 = vmov 0.0  }
 0x153   :  { %2822 = vmatprep.subr.bf16.mxu0 %v3684_v40  ;;  %2854 = vmatprep.subr.bf16.mxu1 %v3686_v41  ;;  %v3095_v40 = vld [vmem:[%s4424_s2] ss:$8 sps:$4 sm:$0xff]   ;;  %v3097_v41 = vld [vmem:[%s4424_s2 + $0x4] ss:$8 sps:$4 sm:$0xff]  }
 0x156   :  { %2824 = vmatpush3.bf16.msra.mxu0 %v3702_v46  ;;  %2856 = vmatpush3.bf16.msra.mxu1 %v3704_v47  ;;  %v3100_v46 = vld [vmem:[%s4424_s2 + $0x14] ss:$8 sps:$4 sm:$0xff]   ;;  %v3098_v47 = vld [vmem:[%s4424_s2 + $0x10] ss:$8 sps:$4 sm:$0xff]  }
 0x157   :  { %2826 = vmatprep.subr.bf16.mxu0 %v3720_v52  ;;  %2858 = vmatprep.subr.bf16.mxu1 %v3722_v53  ;;  %v3103_v52 = vld [vmem:[%s4424_s2 + $0x24] ss:$8 sps:$4 sm:$0xff]   ;;  %v3101_v53 = vld [vmem:[%s4424_s2 + $0x20] ss:$8 sps:$4 sm:$0xff]  }
 0x15a   :  { %2828 = vmatpush3.bf16.msra.mxu0 %v3738_v58  ;;  %2860 = vmatpush3.bf16.msra.mxu1 %v3740_v59  ;;  %v3106_v58 = vld [vmem:[%s4424_s2 + $0x34] ss:$8 sps:$4 sm:$0xff]   ;;  %v3104_v59 = vld [vmem:[%s4424_s2 + $0x30] ss:$8 sps:$4 sm:$0xff]  }
 0x15b   :  { %2830 = vmatprep.subr.bf16.mxu0 %v3756_v0  ;;  %2862 = vmatprep.subr.bf16.mxu1 %v3758_v1  ;;  %v3115_v0 = vld [vmem:[%s4424_s2 + $0x64] ss:$8 sps:$4 sm:$0xff]   ;;  %v3113_v1 = vld [vmem:[%s4424_s2 + $0x60] ss:$8 sps:$4 sm:$0xff]  }
 0x15e   :  { %2832 = vmatpush3.bf16.msra.mxu0 %v3774_v6  ;;  %2864 = vmatpush3.bf16.msra.mxu1 %v3776_v7  ;;  %v3124_v6 = vld [vmem:[%s4424_s2 + $0x94] ss:$8 sps:$4 sm:$0xff]   ;;  %v3122_v7 = vld [vmem:[%s4424_s2 + $0x90] ss:$8 sps:$4 sm:$0xff]  }
 0x15f   :  { %2834 = vmatprep.subr.bf16.mxu0 %v3792_v14  ;;  %2866 = vmatprep.subr.bf16.mxu1 %v3794_v15 }
 0x162   :  { %2836 = vmatpush3.bf16.msra.mxu0 %v3810_v20  ;;  %2868 = vmatpush3.bf16.msra.mxu1 %v3812_v21 }
 0x163   :  { %2838 = vmatprep.subr.bf16.mxu0 %v3816_v24  ;;  %2870 = vmatprep.subr.bf16.mxu1 %v3818_v25 }
 0x166   :  { %2840 = vmatpush3.bf16.msra.mxu0 %v2775_v32  ;;  %2872 = vmatpush3.bf16.msra.mxu1 %v2807_v33 }
 0x167   :  { %2842 = vmatprep.subr.bf16.mxu0 %v2777_v37  ;;  %2874 = vmatprep.subr.bf16.mxu1 %v2809_v38 }
 0x16a   :  { %2844 = vmatpush3.bf16.msra.mxu0 %v2779_v44  ;;  %2876 = vmatpush3.bf16.msra.mxu1 %v2811_v45  ;;  %v3133_v44 = vld [vmem:[%s4424_s2 + $0xc4] ss:$8 sps:$4 sm:$0xff]   ;;  %v3131_v45 = vld [vmem:[%s4424_s2 + $0xc0] ss:$8 sps:$4 sm:$0xff]  }
 0x16b   :  { %921 = vmatprep.subr.mxu1 %v3897_v28  ;;  %1618 = vmatprep.subr.bf16.mxu0 %v3097_v41  ;;  %v1718_v41 = vld [vmem:[%s4427_s5 + $0x90] sm:$0xff] }
 0x16d   :  { %837 = vmatmul.mubr.f32.vlgmr.msra.gmra.mrb[6].mxu0 %v768_v22  ;;  %907 = vmatmul.mubr.f32.vlgmr.msra.gmra.mrb[6].mxu1 %v770_v23  ;;  %v3145_v22 = vld [vmem:[%s4424_s2 + $0x104] ss:$8 sps:$4 sm:$0xff]  }
 0x16e   :  { %985 = vmatprep.mubr.f32.mxu1 %v3272_v35  ;;  %922 = vmatpush1.msra.mxu1 %v3902_v29  ;;  %v1716_v23 = vld [vmem:[%s4427_s5 + $0x80] sm:$0xff] }
 0x16f   :  { %992 = vmatprep.subr.mxu1 %v3907_v34  ;;  %1619 = vmatpush1.bf16.msra.mxu0 %v3095_v40  ;;  %v1701_v40 = vld [vmem:[%s4427_s5 + $0x8] sm:$0xff] }
 0x170   :  { %1620 = vmatprep.subr.bf16.mxu0 %v3100_v46  ;;  %v1719_v46 = vld [vmem:[%s4427_s5 + $0x98] sm:$0xff] }
 0x173   :  { %1621 = vmatpush1.bf16.msra.mxu0 %v3098_v47 }
 0x174   :  { %1622 = vmatprep.subr.bf16.mxu0 %v3103_v52  ;;  %v4045_v52 = vpack.c.bf16 %v1719_v46, %v1718_v41 }
 0x177   :  { %1623 = vmatpush1.bf16.msra.mxu0 %v3101_v53  ;;  %v1702_v53 = vld [vmem:[%s4427_s5 + $0x10] sm:$0xff] }
 0x178   :  { %1624 = vmatprep.subr.bf16.mxu0 %v3106_v58  ;;  %v1703_v58 = vld [vmem:[%s4427_s5 + $0x18] sm:$0xff] }
 0x17b   :  { %1625 = vmatpush1.bf16.msra.mxu0 %v3104_v59  ;;  %v1720_v59 = vld [vmem:[%s4427_s5 + $0xa0] sm:$0xff] }
 0x17c   :  { %1626 = vmatprep.subr.bf16.mxu0 %v3109_v60  ;;  %v1721_v60 = vld [vmem:[%s4427_s5 + $0xa8] sm:$0xff] }
 0x17f   :  { %1627 = vmatpush1.bf16.msra.mxu0 %v3107_v61  ;;  %v4060_v61 = vpack.c.bf16 %v1703_v58, %v1702_v53 }
 0x180   :  { %1628 = vmatprep.subr.bf16.mxu0 %v3112_v62  ;;  %v4063_v62 = vpack.c.bf16 %v1721_v60, %v1720_v59  ;;  %v3148_v59 = vld [vmem:[%s4424_s2 + $0x114] ss:$8 sps:$4 sm:$0xff]  }
 0x183   :  { %1629 = vmatpush1.bf16.msra.mxu0 %v3110_v63  ;;  %v1704_v63 = vld [vmem:[%s4427_s5 + $0x20] sm:$0xff] }
 0x184   :  { %1630 = vmatprep.subr.bf16.mxu0 %v3115_v0  ;;  %v1705_v0 = vld [vmem:[%s4427_s5 + $0x28] sm:$0xff] }
 0x187   :  { %1631 = vmatpush1.bf16.msra.mxu0 %v3113_v1  ;;  %v1722_v1 = vld [vmem:[%s4427_s5 + $0xb0] sm:$0xff] }
 0x188   :  { %1632 = vmatprep.subr.bf16.mxu0 %v3118_v2  ;;  %v1723_v2 = vld [vmem:[%s4427_s5 + $0xb8] sm:$0xff] }
 0x18b   :  { %1633 = vmatpush1.bf16.msra.mxu0 %v3116_v3  ;;  %v4078_v3 = vpack.c.bf16 %v1705_v0, %v1704_v63  ;;  %v3146_v63 = vld [vmem:[%s4424_s2 + $0x110] ss:$8 sps:$4 sm:$0xff]  }
 0x18c   :  { %1634 = vmatprep.subr.bf16.mxu0 %v3121_v4  ;;  %v4081_v4 = vpack.c.bf16 %v1723_v2, %v1722_v1  ;;  %v3151_v1 = vld [vmem:[%s4424_s2 + $0x124] ss:$8 sps:$4 sm:$0xff]   ;;  %v3149_v2 = vld [vmem:[%s4424_s2 + $0x120] ss:$8 sps:$4 sm:$0xff]  }
 0x18f   :  { %1635 = vmatpush1.bf16.msra.mxu0 %v3119_v5  ;;  %v1706_v5 = vld [vmem:[%s4427_s5 + $0x30] sm:$0xff] }
 0x190   :  { %1636 = vmatprep.subr.bf16.mxu0 %v3124_v6  ;;  %v1707_v6 = vld [vmem:[%s4427_s5 + $0x38] sm:$0xff] }
 0x193   :  { %1637 = vmatpush1.bf16.msra.mxu0 %v3122_v7  ;;  %v1724_v7 = vld [vmem:[%s4427_s5 + $0xc0] sm:$0xff] }
 0x194   :  { %1638 = vmatprep.subr.bf16.mxu0 %v3127_v8  ;;  %v1725_v8 = vld [vmem:[%s4427_s5 + $0xc8] sm:$0xff] }
 0x197   :  { %1639 = vmatpush1.bf16.msra.mxu0 %v3125_v11  ;;  %v4096_v11 = vpack.c.bf16 %v1707_v6, %v1706_v5  ;;  %v3154_v5 = vld [vmem:[%s4424_s2 + $0x134] ss:$8 sps:$4 sm:$0xff]   ;;  %v3152_v6 = vld [vmem:[%s4424_s2 + $0x130] ss:$8 sps:$4 sm:$0xff]  }
 0x198   :  { %1640 = vmatprep.subr.bf16.mxu0 %v3130_v12  ;;  %v4099_v12 = vpack.c.bf16 %v1725_v8, %v1724_v7  ;;  %v3157_v7 = vld [vmem:[%s4424_s2 + $0x144] ss:$8 sps:$4 sm:$0xff]   ;;  %v3155_v8 = vld [vmem:[%s4424_s2 + $0x140] ss:$8 sps:$4 sm:$0xff]  }
 0x19b   :  { %1641 = vmatpush1.bf16.msra.mxu0 %v3128_v13  ;;  %v1708_v13 = vld [vmem:[%s4427_s5 + $0x40] sm:$0xff] }
 0x19c   :  { %1642 = vmatprep.subr.bf16.mxu0 %v3133_v44 }
 0x19f   :  { %1643 = vmatpush1.bf16.msra.mxu0 %v3131_v45 }
 0x1a0   :  { %1644 = vmatprep.subr.bf16.mxu0 %v3136_v54 }
 0x1a3   :  { %1645 = vmatpush1.bf16.msra.mxu0 %v3134_v55 }
 0x1a4   :  { %1646 = vmatprep.subr.bf16.mxu0 %v3139_v56 }
 0x1a7   :  { %1647 = vmatpush1.bf16.msra.mxu0 %v3137_v57 }
 0x1a8   :  { %1648 = vmatprep.subr.bf16.mxu0 %v3142_v9 }
 0x1ab   :  { %1649 = vmatpush1.bf16.msra.mxu0 %v3140_v10 }
 0x1ac   :  { %1659 = vmatprep.subr.bf16.mxu0 %v3145_v22 }
 0x220   :  { %v2516_v14 = vpop.f32.mrb[4].mxu0  ;;  %v2551_v15 = vpop.f32.mrb[4].mxu1 }
 0x221   :  { %v2517_v16 = vpop.f32.mrb[5].mxu0  ;;  %v2552_v17 = vpop.f32.mrb[5].mxu1 }
 0x222   :  { %v2518_v18 = vadd.f32 %v2517_v16, %v2516_v14  ;;  %v2553_v19 = vadd.f32 %v2552_v17, %v2551_v15  ;;  %v1709_v14 = vld [vmem:[%s4427_s5 + $0x48] sm:$0xff]  ;;  %v1726_v15 = vld [vmem:[%s4427_s5 + $0xd0] sm:$0xff]  ;;  %v1727_v16 = vld [vmem:[%s4427_s5 + $0xd8] sm:$0xff] }
 0x223   :  { %v4114_v17 = vpack.c.bf16 %v1709_v14, %v1708_v13  ;;  %v3160_v13 = vld [vmem:[%s4424_s2 + $0x154] ss:$8 sps:$4 sm:$0xff]   ;;  %v3158_v14 = vld [vmem:[%s4424_s2 + $0x150] ss:$8 sps:$4 sm:$0xff]  }
 0x224   :  { %v765_v20 = vadd.f32 %v2553_v19, %v2518_v18  ;;  %v4117_v18 = vpack.c.bf16 %v1727_v16, %v1726_v15  ;;  %v1710_v19 = vld [vmem:[%s4427_s5 + $0x50] sm:$0xff]  ;;  %v3163_v15 = vld [vmem:[%s4424_s2 + $0x164] ss:$8 sps:$4 sm:$0xff]   ;;  %v3161_v16 = vld [vmem:[%s4424_s2 + $0x160] ss:$8 sps:$4 sm:$0xff]  }
 0x226   :  { %v912_v31 = vmul.f32 %v765_v20, %v765_v20  ;;  %v1067_v38 = vsub.f32 0.0, %v765_v20  ;;  %v1711_v20 = vld [vmem:[%s4427_s5 + $0x58] sm:$0xff] }
 0x240   :  { %v2586_v21 = vpop.f32.mrb[6].mxu0  ;;  %v2621_v24 = vpop.f32.mrb[6].mxu1 }
 0x241   :  { %v2587_v25 = vpop.f32.mrb[7].mxu0  ;;  %v2622_v26 = vpop.f32.mrb[7].mxu1 }
 0x242   :  { %v2588_v27 = vadd.f32 %v2587_v25, %v2586_v21  ;;  %v2623_v30 = vadd.f32 %v2622_v26, %v2621_v24  ;;  %v1728_v21 = vld [vmem:[%s4427_s5 + $0xe0] sm:$0xff]  ;;  %v1729_v24 = vld [vmem:[%s4427_s5 + $0xe8] sm:$0xff]  ;;  %v4132_v25 = vpack.c.bf16 %v1711_v20, %v1710_v19  ;;  %v3166_v19 = vld [vmem:[%s4424_s2 + $0x174] ss:$8 sps:$4 sm:$0xff]  }
 0x243   :  { %v4135_v26 = vpack.c.bf16 %v1729_v24, %v1728_v21  ;;  %v3164_v20 = vld [vmem:[%s4424_s2 + $0x170] ss:$8 sps:$4 sm:$0xff]   ;;  %v3169_v21 = vld [vmem:[%s4424_s2 + $0x184] ss:$8 sps:$4 sm:$0xff]   ;;  %v3167_v24 = vld [vmem:[%s4424_s2 + $0x180] ss:$8 sps:$4 sm:$0xff]  }
 0x244   :  { %v909_v32 = vadd.f32 %v2623_v30, %v2588_v27  ;;  %v1712_v27 = vld [vmem:[%s4427_s5 + $0x60] sm:$0xff]  ;;  %v1713_v30 = vld [vmem:[%s4427_s5 + $0x68] sm:$0xff] }
 0x246   :  { %v913_v33 = vsub.f32 %v909_v32, %v912_v31  ;;  %v1730_v31 = vld [vmem:[%s4427_s5 + $0xf0] sm:$0xff]  ;;  %v1731_v32 = vld [vmem:[%s4427_s5 + $0xf8] sm:$0xff] }
 0x248   :  { %v914_v36 = vmax.f32 %v913_v33, 0.0  ;;  %v4150_v33 = vpack.c.bf16 %v1713_v30, %v1712_v27  ;;  %v3172_v27 = vld [vmem:[%s4424_s2 + $0x194] ss:$8 sps:$4 sm:$0xff]   ;;  %v3170_v30 = vld [vmem:[%s4424_s2 + $0x190] ss:$8 sps:$4 sm:$0xff]  }
 0x24a   :  { %v915_v37 = vadd.f32 1e-05, %v914_v36  ;;  %v4153_v36 = vpack.c.bf16 %v1731_v32, %v1730_v31  ;;  %v3175_v31 = vld [vmem:[%s4424_s2 + $0x1a4] ss:$8 sps:$4 sm:$0xff]   ;;  %v3173_v32 = vld [vmem:[%s4424_s2 + $0x1a0] ss:$8 sps:$4 sm:$0xff]  }
 0x24c   :  { %3191 = vrsqrt.f32 %v915_v37  ;;  %v1714_v37 = vld [vmem:[%s4427_s5 + $0x70] sm:$0xff] }
 0x256   :  { %v3192_v42 = vpop.eup %3191 }
 0x257   :  { %2409 = vmatmul.mubr.msk.f32.vlgmr.msra.gmra.mrb[8].mxu1 %vm917_vm0, %v3192_v42  ;;  %v1068_v43 = vmul.f32 %v3192_v42, %v1067_v38  ;;  %v1715_v38 = vld [vmem:[%s4427_s5 + $0x78] sm:$0xff] }
 0x258   :  { %993 = vmatpush1.msra.mxu1 %v626_v39  ;;  %1056 = vmatprep.mubr.f32.mxu1 %v3272_v35 }
 0x259   :  { %1072 = vmatprep.subr.mxu1 %v3897_v28  ;;  %v1717_v28 = vld [vmem:[%s4427_s5 + $0x88] sm:$0xff] }
 0x25b   :  { %2410 = vmatmul.mubr.msk.f32.vlgmr.msra.gmra.mrb[10].mxu1 %vm917_vm0, %v3192_v42 }
 0x25c   :  { %1073 = vmatpush1.msra.mxu1 %v3902_v29  ;;  %1136 = vmatprep.mubr.f32.mxu1 %v3272_v35  ;;  %v1700_v29 = vld [vmem:[%s4427_s5] sm:$0xff] }
 0x25d   :  { %1143 = vmatprep.subr.mxu1 %v3907_v34  ;;  %v2877_v34 = vpack.c.bf16 %v1717_v28, %v1716_v23  ;;  %v4043_v47 = vpack.c.bf16 %v1701_v40, %v1700_v29 }
 0x25f   :  { %2411 = vmatmul.mubr.msk.f32.vlgmr.msra.gmra.mrb[12].mxu1 %vm917_vm0, %v1068_v43 }
 0x260   :  { %1144 = vmatpush1.msra.mxu1 %v626_v39  ;;  %1207 = vmatprep.mubr.f32.mxu1 %v3272_v35  ;;  %v4162_v39 = vpack.c.bf16 %v1715_v38, %v1714_v37  ;;  %v3178_v37 = vld [vmem:[%s4424_s2 + $0x1b4] ss:$8 sps:$4 sm:$0xff]   ;;  %v3176_v38 = vld [vmem:[%s4424_s2 + $0x1b0] ss:$8 sps:$4 sm:$0xff]  }
 0x261   :  { %2878 = vmatprep.subr.bf16.mxu1 %v2877_v34 }
 0x263   :  { %2412 = vmatmul.mubr.msk.f32.vlgmr.msra.gmra.mrb[14].mxu1 %vm917_vm0, %v1068_v43 }
 0x264   :  { %2880 = vmatpush3.bf16.msra.mxu1 %v4043_v47 }
 0x265   :  { %2882 = vmatprep.subr.bf16.mxu1 %v4045_v52 }
 0x268   :  { %2884 = vmatpush3.bf16.msra.mxu1 %v4060_v61 }
 0x269   :  { %2886 = vmatprep.subr.bf16.mxu1 %v4063_v62 }
 0x26c   :  { %2888 = vmatpush3.bf16.msra.mxu1 %v4078_v3 }
 0x26d   :  { %2890 = vmatprep.subr.bf16.mxu1 %v4081_v4 }
 0x270   :  { %2892 = vmatpush3.bf16.msra.mxu1 %v4096_v11 }
 0x271   :  { %2894 = vmatprep.subr.bf16.mxu1 %v4099_v12 }
 0x274   :  { %2896 = vmatpush3.bf16.msra.mxu1 %v4114_v17 }
 0x275   :  { %2898 = vmatprep.subr.bf16.mxu1 %v4117_v18 }
 0x278   :  { %2900 = vmatpush3.bf16.msra.mxu1 %v4132_v25 }
 0x279   :  { %2902 = vmatprep.subr.bf16.mxu1 %v4135_v26 }
 0x27c   :  { %2904 = vmatpush3.bf16.msra.mxu1 %v4150_v33 }
 0x27d   :  { %2906 = vmatprep.subr.bf16.mxu1 %v4153_v36 }
 0x280   :  { %2908 = vmatpush3.bf16.msra.mxu1 %v4162_v39 }
 0x281   :  { %2910 = vmatprep.subr.bf16.mxu1 %v2877_v34 }
 0x32a   :  { %v987_v42 = vpop.f32.mrb[8].mxu1 }
 0x32b   :  { %v1063_v43 = vmul.f32 %v987_v42, %v3850_v48  ;;  %v989_v44 = vpop.f32.mrb[9].mxu1  ;;  %v3181_v42 = vld [vmem:[%s4424_s2 + $0x1c4] ss:$8 sps:$4 sm:$0xff]  }
 0x32c   :  { %v1064_v45 = vmul.f32 %v989_v44, %v3854_v50  ;;  %v3184_v44 = vld [vmem:[%s4424_s2 + $0x1d4] ss:$8 sps:$4 sm:$0xff]  }
 0x32e   :  { %v1058_v54 = vpop.f32.mrb[10].mxu1 }
 0x32f   :  { %v1065_v55 = vmul.f32 %v1058_v54, %v3852_v49  ;;  %v1060_v56 = vpop.f32.mrb[11].mxu1  ;;  %v3143_v49 = vld [vmem:[%s4424_s2 + $0x100] ss:$8 sps:$4 sm:$0xff]   ;;  %v3187_v54 = vld [vmem:[%s4424_s2 + $0x1e4] ss:$8 sps:$4 sm:$0xff]  }
 0x330   :  { %v1066_v57 = vmul.f32 %v1060_v56, %v3856_v51  ;;  %v3190_v56 = vld [vmem:[%s4424_s2 + $0x1f4] ss:$8 sps:$4 sm:$0xff]  }
 0x332   :  { %v1138_v9 = vpop.f32.mrb[12].mxu1 }
 0x333   :  { %v1214_v10 = vadd.f32 %v1138_v9, %v1063_v43  ;;  %v1140_v22 = vpop.f32.mrb[13].mxu1  ;;  %v3179_v43 = vld [vmem:[%s4424_s2 + $0x1c0] ss:$8 sps:$4 sm:$0xff]   ;;  %v3188_v9 = vld [vmem:[%s4424_s2 + $0x1f0] ss:$8 sps:$4 sm:$0xff]  }
 0x334   :  { %v1215_v23 = vadd.f32 %v1140_v22, %v1064_v45  ;;  %v3182_v45 = vld [vmem:[%s4424_s2 + $0x1d0] ss:$8 sps:$4 sm:$0xff]  }
 0x335   :  { %vm1218_vm1 = vcmp.gt.f32.partialorder %v1214_v10, 0.0  ;;  %v1222_v28 = vmul.f32 0.2, %v1214_v10 }
 0x336   :  { %vm1219_vm2 = vcmp.gt.f32.partialorder %v1215_v23, 0.0  ;;  %v1223_v29 = vmul.f32 0.2, %v1215_v23  ;;  %v1209_v34 = vpop.f32.mrb[14].mxu1 }
 0x337   :  { %v1226_v40 = vsel %vm1218_vm1, %v1214_v10, %v1222_v28  ;;  %v4170_v48 = vadd.f32 %v1209_v34, %v1065_v55  ;;  %v1211_v41 = vpop.f32.mrb[15].mxu1  ;;  %v3185_v55 = vld [vmem:[%s4424_s2 + $0x1e0] ss:$8 sps:$4 sm:$0xff]  }
 0x338   :  { %v1217_v50 = vadd.f32 %v1211_v41, %v1066_v57  ;;  %v1227_v46 = vsel %vm1219_vm2, %v1215_v23, %v1223_v29  ;;  %v1230_v51 = vpack.c.bf16 %v1226_v40, %v1226_v40 }
 0x339   :  { %v1231_v53 = vpack.c.bf16 %v1227_v46, %v1227_v46  ;;  %v1224_v57 = vmul.f32 0.2, %v4170_v48  ;;  %vm1220_vm4 = vcmp.gt.f32.partialorder %v4170_v48, 0.0  ;;  %v2061_v46 = vld [vmem:[%s4429_s7 + $0x88] sm:$0xff] }
 0x33a   :  { %vm1221_vm3 = vcmp.gt.f32.partialorder %v1217_v50, 0.0  ;;  %v1225_v58 = vmul.f32 0.2, %v1217_v50 }
 0x33b   :  { %1650 = vmatprep.mubr.bf16.mxu0 %v1231_v53  ;;  %v1228_v10 = vsel %vm1220_vm4, %v4170_v48, %v1224_v57  ;;  %v2055_v57 = vld [vmem:[%s4429_s7 + $0x58] sm:$0xff] }
 0x33c   :  { %1651 = vmatmul.mubr.bf16.vlgmr.msra.gmra.mrb[8].mxu0 %v1230_v51  ;;  %v1229_v60 = vsel %vm1221_vm3, %v1217_v50, %v1225_v58  ;;  %v1232_v22 = vpack.c.bf16 %v1228_v10, %v1228_v10  ;;  %v2060_v50 = vld [vmem:[%s4429_s7 + $0x80] sm:$0xff]  ;;  %v2045_v58 = vld [vmem:[%s4429_s7 + $0x8] sm:$0xff] }
 0x33d   :  { %1660 = vmatpush1.bf16.msra.mxu0 %v3143_v49  ;;  %v1233_v0 = vpack.c.bf16 %v1229_v60, %v1229_v60  ;;  %v2949_v49 = vpack.c.bf16 %v2061_v46, %v2060_v50  ;;  %v2044_v51 = vld [vmem:[%s4429_s7] sm:$0xff]  ;;  %v2062_v60 = vld [vmem:[%s4429_s7 + $0x90] sm:$0xff] }
 0x33e   :  { %1661 = vmatprep.subr.bf16.mxu0 %v3148_v59  ;;  %v2072_v10 = vld [vmem:[%s4429_s7 + $0xe0] sm:$0xff] }
 0x33f   :  { %1691 = vmatprep.mubr.bf16.mxu0 %v1233_v0 }
 0x341   :  { %1662 = vmatpush1.bf16.msra.mxu0 %v3146_v63  ;;  %v2063_v63 = vld [vmem:[%s4429_s7 + $0x98] sm:$0xff] }
 0x342   :  { %1663 = vmatprep.subr.bf16.mxu0 %v3151_v1  ;;  %v2951_v1 = vpack.c.bf16 %v2045_v58, %v2044_v51 }
 0x345   :  { %1664 = vmatpush1.bf16.msra.mxu0 %v3149_v2  ;;  %v2953_v2 = vpack.c.bf16 %v2063_v63, %v2062_v60  ;;  %v2182_v60 = vld [vmem:[#allocation4 + $0x8] sm:$0xff]  ;;  %v3273_v63 = vmov 0.0|0.0  }
 0x346   :  { %1665 = vmatprep.subr.bf16.mxu0 %v3154_v5  ;;  %v2046_v5 = vld [vmem:[%s4429_s7 + $0x10] sm:$0xff] }
 0x349   :  { %1666 = vmatpush1.bf16.msra.mxu0 %v3152_v6  ;;  %v2047_v6 = vld [vmem:[%s4429_s7 + $0x18] sm:$0xff] }
 0x34a   :  { %1667 = vmatprep.subr.bf16.mxu0 %v3157_v7  ;;  %v2064_v7 = vld [vmem:[%s4429_s7 + $0xa0] sm:$0xff] }
 0x34d   :  { %1668 = vmatpush1.bf16.msra.mxu0 %v3155_v8  ;;  %v2065_v8 = vld [vmem:[%s4429_s7 + $0xa8] sm:$0xff] }
 0x34e   :  { %1669 = vmatprep.subr.bf16.mxu0 %v3160_v13  ;;  %v2955_v13 = vpack.c.bf16 %v2047_v6, %v2046_v5 }
 0x351   :  { %1670 = vmatpush1.bf16.msra.mxu0 %v3158_v14  ;;  %v2957_v14 = vpack.c.bf16 %v2065_v8, %v2064_v7 }
 0x352   :  { %1671 = vmatprep.subr.bf16.mxu0 %v3163_v15  ;;  %v2048_v15 = vld [vmem:[%s4429_s7 + $0x20] sm:$0xff] }
 0x355   :  { %1672 = vmatpush1.bf16.msra.mxu0 %v3161_v16  ;;  %v2049_v16 = vld [vmem:[%s4429_s7 + $0x28] sm:$0xff] }
 0x356   :  { %1673 = vmatprep.subr.bf16.mxu0 %v3166_v19  ;;  %v2066_v19 = vld [vmem:[%s4429_s7 + $0xb0] sm:$0xff] }
 0x359   :  { %1674 = vmatpush1.bf16.msra.mxu0 %v3164_v20  ;;  %v2067_v20 = vld [vmem:[%s4429_s7 + $0xb8] sm:$0xff] }
 0x35a   :  { %1675 = vmatprep.subr.bf16.mxu0 %v3169_v21  ;;  %v2959_v21 = vpack.c.bf16 %v2049_v16, %v2048_v15 }
 0x35d   :  { %1676 = vmatpush1.bf16.msra.mxu0 %v3167_v24  ;;  %v2961_v24 = vpack.c.bf16 %v2067_v20, %v2066_v19  ;;  %v2479_v19 = vld [vmem:[%s4430_s8] ss:$0 sm:$0xff] }
 0x35e   :  { %1677 = vmatprep.subr.bf16.mxu0 %v3172_v27  ;;  %v2050_v27 = vld [vmem:[%s4429_s7 + $0x30] sm:$0xff] }
 0x361   :  { %1678 = vmatpush1.bf16.msra.mxu0 %v3170_v30  ;;  %v2051_v30 = vld [vmem:[%s4429_s7 + $0x38] sm:$0xff] }
 0x362   :  { %1679 = vmatprep.subr.bf16.mxu0 %v3175_v31  ;;  %v2068_v31 = vld [vmem:[%s4429_s7 + $0xc0] sm:$0xff] }
 0x365   :  { %1680 = vmatpush1.bf16.msra.mxu0 %v3173_v32  ;;  %v2069_v32 = vld [vmem:[%s4429_s7 + $0xc8] sm:$0xff] }
 0x366   :  { %1681 = vmatprep.subr.bf16.mxu0 %v3178_v37  ;;  %v2963_v37 = vpack.c.bf16 %v2051_v30, %v2050_v27  ;;  %v2179_v27 = vld [vmem:[#allocation2] sm:$0xff]  ;;  %v2180_v30 = vld [vmem:[#allocation2 + $0x8] sm:$0xff] }
 0x369   :  { %1682 = vmatpush1.bf16.msra.mxu0 %v3176_v38  ;;  %v2965_v38 = vpack.c.bf16 %v2069_v32, %v2068_v31 }
 0x36a   :  { %1683 = vmatprep.subr.bf16.mxu0 %v3181_v42  ;;  %v2052_v42 = vld [vmem:[%s4429_s7 + $0x40] sm:$0xff] }
 0x36d   :  { %1684 = vmatpush1.bf16.msra.mxu0 %v3179_v43  ;;  %v2053_v43 = vld [vmem:[%s4429_s7 + $0x48] sm:$0xff] }
 0x36e   :  { %1685 = vmatprep.subr.bf16.mxu0 %v3184_v44  ;;  %v2967_v44 = vpack.c.bf16 %v2053_v43, %v2052_v42 }
 0x371   :  { %1686 = vmatpush1.bf16.msra.mxu0 %v3182_v45  ;;  %v2070_v45 = vld [vmem:[%s4429_s7 + $0xd0] sm:$0xff] }
 0x372   :  { %1687 = vmatprep.subr.bf16.mxu0 %v3187_v54  ;;  %v2071_v54 = vld [vmem:[%s4429_s7 + $0xd8] sm:$0xff] }
 0x375   :  { %1688 = vmatpush1.bf16.msra.mxu0 %v3185_v55  ;;  %v2969_v55 = vpack.c.bf16 %v2071_v54, %v2070_v45  ;;  %v2483_v45 = vld [vmem:[#allocation6] ss:$0 sm:$0xff] }
 0x376   :  { %1689 = vmatprep.subr.bf16.mxu0 %v3190_v56  ;;  %v2054_v56 = vld [vmem:[%s4429_s7 + $0x50] sm:$0xff] }
 0x379   :  { %1690 = vmatpush1.bf16.msra.mxu0 %v3188_v9  ;;  %v2971_v9 = vpack.c.bf16 %v2055_v57, %v2054_v56 }
 0x37c   :  { %1692 = vmatmul.mubr.bf16.vlgmr.msra.gmra.mrb[8].mxu0 %v1232_v22  ;;  %v2073_v22 = vld [vmem:[%s4429_s7 + $0xe8] sm:$0xff] }
 0x44f   :  { %v4268_v23 = vpop.f32.mrb[8].mxu0 }
 0x450   :  { %v4270_v28 = vpop.f32.mrb[9].mxu0 }
 0x451   :  { %v1807_v29 = vmul.f32 %v4270_v28, %v4270_v28  ;;  %v1697_v34 = vpop.f32.mrb[10].mxu0  ;;  %1800 = vmatprep.mubr.f32.mxu1 %v4270_v28 }
 0x452   :  { %v1698_v40 = vpop.f32.mrb[11].mxu0  ;;  %1801 = vmatmul.mubr.f32.vlgmr.msra.gmra.mrb[16].mxu1 %v4268_v23  ;;  %v2056_v34 = vld [vmem:[%s4429_s7 + $0x60] sm:$0xff] }
 0x453   :  { %2912 = vmatpush3.bf16.msra.mxu1 %v4043_v47  ;;  %1872 = vmatprep.mubr.f32.mxu1 %v1807_v29  ;;  %v1806_v47 = vmul.f32 %v4268_v23, %v4268_v23  ;;  %v2973_v29 = vpack.c.bf16 %v2073_v22, %v2072_v10  ;;  %v2057_v40 = vld [vmem:[%s4429_s7 + $0x68] sm:$0xff] }
 0x454   :  { %2914 = vmatprep.subr.bf16.mxu1 %v4045_v52  ;;  %v1733_v52 = vld [vmem:[%s4428_s6 + $0x8] sm:$0xff] }
 0x457   :  { %2916 = vmatpush3.bf16.msra.mxu1 %v4060_v61  ;;  %v1735_v61 = vld [vmem:[%s4428_s6 + $0x18] sm:$0xff] }
 0x458   :  { %2918 = vmatprep.subr.bf16.mxu1 %v4063_v62  ;;  %v1732_v62 = vld [vmem:[%s4428_s6] sm:$0xff] }
 0x45b   :  { %2920 = vmatpush3.bf16.msra.mxu1 %v4078_v3  ;;  %v2941_v3 = vpack.c.bf16 %v1735_v61, %v1733_v52  ;;  %v2074_v52 = vld [vmem:[%s4429_s7 + $0xf0] sm:$0xff]  ;;  %v2075_v61 = vld [vmem:[%s4429_s7 + $0xf8] sm:$0xff] }
 0x45c   :  { %2922 = vmatprep.subr.bf16.mxu1 %v4081_v4  ;;  %v1734_v4 = vld [vmem:[%s4428_s6 + $0x10] sm:$0xff] }
 0x45f   :  { %2924 = vmatpush3.bf16.msra.mxu1 %v4096_v11  ;;  %v2943_v11 = vpack.c.bf16 %v1734_v4, %v1732_v62  ;;  %v2977_v62 = vpack.c.bf16 %v2075_v61, %v2074_v52  ;;  %v2059_v4 = vld [vmem:[%s4429_s7 + $0x78] sm:$0xff] }
 0x460   :  { %2926 = vmatprep.subr.bf16.mxu1 %v4099_v12 }
 0x463   :  { %2928 = vmatpush3.bf16.msra.mxu1 %v4114_v17 }
 0x464   :  { %2930 = vmatprep.subr.bf16.mxu1 %v4117_v18 }
 0x467   :  { %2932 = vmatpush3.bf16.msra.mxu1 %v4132_v25 }
 0x468   :  { %2934 = vmatprep.subr.bf16.mxu1 %v4135_v26 }
 0x46b   :  { %2936 = vmatpush3.bf16.msra.mxu1 %v4150_v33 }
 0x46c   :  { %2938 = vmatprep.subr.bf16.mxu1 %v4153_v36 }
 0x46f   :  { %2940 = vmatpush3.bf16.msra.mxu1 %v4162_v39 }
 0x470   :  { %2942 = vmatprep.subr.bf16.mxu1 %v2941_v3 }
 0x472   :  { %1873 = vmatmul.mubr.f32.vlgmr.msra.gmra.mrb[18].mxu1 %v1806_v47  ;;  %v2975_v47 = vpack.c.bf16 %v2057_v40, %v2056_v34 }
 0x473   :  { %1951 = vmatprep.mubr.f32.mxu1 %v3272_v35  ;;  %2944 = vmatpush1.bf16.msra.mxu1 %v2943_v11 }
 0x474   :  { %2946 = vmatprep.subr.bf16.mxu1 %v2941_v3  ;;  %v2058_v3 = vld [vmem:[%s4429_s7 + $0x70] sm:$0xff] }
 0x525   :  { %v2656_v12 = vpop.f32.mrb[16].mxu1 }
 0x526   :  { %v2657_v17 = vpop.f32.mrb[17].mxu1 }
 0x527   :  { %v2658_v18 = vadd.f32 %v2657_v17, %v2656_v12 }
 0x529   :  { %v1878_v33 = vmul.f32 %v2658_v18, %v2658_v18  ;;  %v1960_v53 = vsub.f32 0.0, %v2658_v18 }
 0x545   :  { %v2691_v25 = vpop.f32.mrb[18].mxu1 }
 0x546   :  { %v2692_v26 = vpop.f32.mrb[19].mxu1 }
 0x547   :  { %v2693_v36 = vadd.f32 %v2692_v26, %v2691_v25 }
 0x549   :  { %v1879_v39 = vsub.f32 %v2693_v36, %v1878_v33 }
 0x54b   :  { %v1880_v48 = vmax.f32 %v1879_v39, 0.0 }
 0x54d   :  { %v1881_v41 = vadd.f32 1e-05, %v1880_v48 }
 0x54f   :  { %3193 = vrsqrt.f32 %v1881_v41 }
 0x559   :  { %v3194_v59 = vpop.eup %3193 }
 0x55a   :  { %2477 = vmatmul.mubr.msk.f32.vlgmr.msra.gmra.mrb[20].mxu1 %vm1883_vm5, %v3194_v59  ;;  %v1961_v0 = vmul.f32 %v3194_v59, %v1960_v53  ;;  %v2181_v59 = vld [vmem:[#allocation4] sm:$0xff] }
 0x55b   :  { %2948 = vmatpush1.bf16.msra.mxu1 %v2943_v11  ;;  %2029 = vmatprep.mubr.f32.mxu1 %v3272_v35  ;;  %v2979_v11 = vpack.c.bf16 %v2059_v4, %v2058_v3 }
 0x55c   :  { %2950 = vmatprep.subr.bf16.mxu1 %v2949_v49 }
 0x55e   :  { %2478 = vmatmul.mubr.msk.f32.vlgmr.msra.gmra.mrb[22].mxu1 %vm1883_vm5, %v1961_v0  ;;  %v2982_v0 = vpack.c.bf16 %v2182_v60, %v2181_v59 }
 0x55f   :  { %2952 = vmatpush3.bf16.msra.mxu1 %v2951_v1 }
 0x560   :  { %2954 = vmatprep.subr.bf16.mxu1 %v2953_v2 }
 0x563   :  { %2956 = vmatpush3.bf16.msra.mxu1 %v2955_v13 }
 0x564   :  { %2958 = vmatprep.subr.bf16.mxu1 %v2957_v14 }
 0x567   :  { %2960 = vmatpush3.bf16.msra.mxu1 %v2959_v21  ;;  %v2480_v21 = vld [vmem:[%s4430_s8 + $0x1] ss:$0 sm:$0xff] }
 0x568   :  { %2962 = vmatprep.subr.bf16.mxu1 %v2961_v24 }
 0x56b   :  { %2964 = vmatpush3.bf16.msra.mxu1 %v2963_v37  ;;  %v2985_v37 = vpack.c.bf16 %v2180_v30, %v2179_v27 }
 0x56c   :  { %2966 = vmatprep.subr.bf16.mxu1 %v2965_v38 }
 0x56f   :  { %2968 = vmatpush3.bf16.msra.mxu1 %v2967_v44 }
 0x570   :  { %2970 = vmatprep.subr.bf16.mxu1 %v2969_v55 }
 0x573   :  { %2972 = vmatpush3.bf16.msra.mxu1 %v2971_v9 }
 0x574   :  { %2974 = vmatprep.subr.bf16.mxu1 %v2973_v29 }
 0x577   :  { %2976 = vmatpush3.bf16.msra.mxu1 %v2975_v47 }
 0x578   :  { %2978 = vmatprep.subr.bf16.mxu1 %v2977_v62 }
 0x57b   :  { %2980 = vmatpush3.bf16.msra.mxu1 %v2979_v11 }
 0x57c   :  { %2981 = vmatprep.subr.bf16.mxu1 %v3273_v63 }
 0x62d   :  { %v1953_v12 = vpop.f32.mrb[20].mxu1 }
 0x62e   :  { %v1958_v17 = vmul.f32 %v1953_v12, %v4268_v23  ;;  %v1955_v18 = vpop.f32.mrb[21].mxu1 }
 0x62f   :  { %v1959_v25 = vmul.f32 %v1955_v18, %v4270_v28 }
 0x631   :  { %v2031_v26 = vpop.f32.mrb[22].mxu1 }
 0x632   :  { %v2036_v33 = vadd.f32 %v2031_v26, %v1958_v17  ;;  %v2033_v36 = vpop.f32.mrb[23].mxu1 }
 0x633   :  { %v2037_v39 = vadd.f32 %v2033_v36, %v1959_v25 }
 0x634   :  { %v2040_v48 = vmul.f32 0.2, %v2036_v33  ;;  %vm2038_vm6 = vcmp.gt.f32.partialorder %v2036_v33, 0.0 }
 0x635   :  { %v2041_v41 = vmul.f32 0.2, %v2037_v39  ;;  %vm2039_vm7 = vcmp.gt.f32.partialorder %v2037_v39, 0.0 }
 0x636   :  { %v2042_v46 = vsel %vm2038_vm6, %v2036_v33, %v2040_v48 }
 0x637   :  { %v2043_v50 = vsel %vm2039_vm7, %v2037_v39, %v2041_v41 }
 0x638   :  { %2140 = vmatprep.mubr.f32.mxu1 %v2043_v50 }
 0x639   :  { %2141 = vmatmul.mubr.f32.vlgmr.msra.gmra.mrb[24].mxu1 %v2042_v46 }
 0x63a   :  { %2739 = vmatprep.mubr.msk.f32.mxu1 %vm3274_vm9, %v3272_v35  ;;  %2983 = vmatpush3.bf16.msra.mxu1 %v2982_v0 }
 0x63b   :  { %2984 = vmatprep.subr.bf16.mxu1 %v3273_v63 }
 0x70c   :  { %v2726_v53 = vpop.f32.mrb[24].mxu1 }
 0x70d   :  { %v2727_v49 = vpop.f32.mrb[25].mxu1 }
 0x70e   :  { %v2728_v51 = vadd.f32 %v2727_v49, %v2726_v53 }
 0x710   :  { %v2147_v23 = vsel %vm2146_vm8, %v2728_v51, 0.0  ;;  %v2152_v58 = vmul.f32 %v2728_v51, %v2728_v51 }
 0x711   :  { %2148 = vadd.xlane.f32.xlu0 %v2147_v23 }
 0x712   :  { %v2153_v28 = vsel %vm2146_vm8, %v2152_v58, 0.0 }
 0x715   :  { %2154 = vadd.xlane.f32.xlu0 %v2153_v28 }
 0x79e   :  { %v2149_v1 = vpop.xlane.xlu0 %2148 }
 0x79f   :  { %v2151_v2 = vmul.f32 0.0625, %v2149_v1 }
 0x7a1   :  { %v2158_v6 = vmul.f32 %v2151_v2, %v2151_v2  ;;  %v2157_v15 = vsub.f32 %v2728_v51, %v2151_v2 }
 0x7a2   :  { %v2155_v5 = vpop.xlane.xlu0 %2154 }
 0x7a3   :  { %v2156_v7 = vmul.f32 0.0625, %v2155_v5 }
 0x7a5   :  { %v2159_v8 = vsub.f32 %v2156_v7, %v2158_v6 }
 0x7a7   :  { %v2160_v13 = vmax.f32 %v2159_v8, 0.0 }
 0x7a9   :  { %v2161_v14 = vadd.f32 1e-05, %v2160_v13 }
 0x7ab   :  { %3195 = vrsqrt.f32 %v2161_v14 }
 0x7b5   :  { %v3196_v16 = vpop.eup %3195 }
 0x7b6   :  { %v2163_v20 = vmul.f32 %v3196_v16, %v2157_v15 }
 0x7b8   :  { %v2169_v24 = vmul.f32 %v2479_v19, %v2163_v20 }
 0x7ba   :  { %v2175_v31 = vadd.f32 %v2480_v21, %v2169_v24 }
 0x7bc   :  { %vm2176_vm10 = vcmp.gt.f32.partialorder %v2175_v31, 0.0  ;;  %v2177_v32 = vmul.f32 0.2, %v2175_v31 }
 0x7be   :  { %v2178_v38 = vsel %vm2176_vm10, %v2175_v31, %v2177_v32 }
 0x7bf   :  { %2740 = vmatmul.mubr.msk.f32.vlgmr.msra.gmra.mrb[26].mxu1 %vm1883_vm5, %v2178_v38 }
 0x7c0   :  { %2986 = vmatpush3.bf16.msra.mxu1 %v2985_v37  ;;  %2746 = vmatprep.mubr.msk.f32.mxu1 %vm3274_vm9, %v3272_v35 }
 0x7c3   :  { %2747 = vmatmul.mubr.msk.f32.vlgmr.msra.gmra.mrb[28].mxu1 %vm1883_vm5, %v2728_v51 }
 0x892   :  { %v2252_v42 = vpop.f32.mrb[26].mxu1 }
 0x893   :  { %v2741_v43 = vpop.f32.mrb[27].mxu1 }
 0x896   :  { %v2325_v44 = vpop.f32.mrb[28].mxu1 }
 0x897   :  { %v2326_v54 = vadd.f32 %v2325_v44, %v2252_v42  ;;  %v2748_v55 = vpop.f32.mrb[29].mxu1 }
 0x899   :  { %v2336_v56 = vadd.f32 %v2483_v45, %v2326_v54 }
 0x89b   :  { %2337 = vst [vmem:[%s4434_s12] sm:$0x3] %v2336_v56 }
 0x89c   :  { %2342 = vsyncpa [#allocation3], 1 }
 0x89d   :  { %2343 = vsyncpa [#allocation5], 1 }

</bundles_post_ra>
